<compile_context>
chip_gen: v7x
topology: tpu7x:2x2x1
jax: 0.10.0
libtpu: 0.0.40
codegen_flags: <defaults>
</compile_context>

<pallas_src>
import jax
import jax.numpy as jnp
from jax.experimental import pallas as pl
from jax.experimental.pallas import tpu as pltpu

C_IN = 3
C_OUT = 16
KSIZE = 3
STRIDE = 2
PAD = 1
K_RAW = C_IN * KSIZE * KSIZE * KSIZE      # 81
K_PAD = 128                                # contraction padded to a full lane


def _im2col_3d_T(x, k=KSIZE, s=STRIDE, p=PAD):
    """x: (N, C, T, H, W) -> patch_T (C*k^3, N*To*Ho*Wo) bf16, plus (To,Ho,Wo).

    K index is C-major / kernel-offset-minor, matching w.reshape(C_OUT, -1).
    M index is clip-major: m = n*P + (to*Ho*Wo + ho*Wo + wo).
    """
    N, C, T, H, W = x.shape
    To = (T + 2 * p - k) // s + 1
    Ho = (H + 2 * p - k) // s + 1
    Wo = (W + 2 * p - k) // s + 1
    xp = jnp.pad(x.astype(jnp.bfloat16),
                 ((0, 0), (0, 0), (p, p), (p, p), (p, p)))
    cols = []
    for dt in range(k):
        for dh in range(k):
            for dw in range(k):
                cols.append(
                    xp[:, :, dt:dt + s * To:s, dh:dh + s * Ho:s, dw:dw + s * Wo:s])
    patches = jnp.stack(cols, axis=0)                  # (k^3, N, C, To, Ho, Wo)
    patches = patches.transpose(2, 0, 1, 3, 4, 5)      # (C, k^3, N, To, Ho, Wo)
    patch_t = patches.reshape(C * k * k * k, N * To * Ho * Wo)
    return patch_t, (To, Ho, Wo)


def _i3d_stem_kernel(w_ref, b_ref, patch_ref, o_ref):
    # w_ref: (C_OUT, K_PAD) bf16, b_ref: (C_OUT, 1) f32,
    # patch_ref: (K_PAD, M_BLK) bf16, o_ref: (C_OUT, M_BLK) f32
    y = jnp.dot(w_ref[...], patch_ref[...],
                preferred_element_type=jnp.float32)     # MXU, f32 accumulate
    y = y + b_ref[...]                                  # f32 bias (lane bcast)
    o_ref[...] = jnp.maximum(y, 0.0)                    # f32 ReLU


def i3d_forward(video_pack, w, b):
    """Mini I3D stem: conv3d(k=3, s=2, p=1) + ReLU + global avg pool.

    video_pack: (Nt, C_IN, 16, H, W) ->
      feamap  (Nt, C_OUT, T', H', W')
      feature (Nt, C_OUT)
    """
    Nt = video_pack.shape[0]
    patch_t, (To, Ho, Wo) = _im2col_3d_T(video_pack)
    P = To * Ho * Wo
    M_total = Nt * P

    # zero-pad contraction dim to 128 (exact), keep bf16 for DMA + MXU.
    patch_t = jnp.pad(patch_t, ((0, K_PAD - K_RAW), (0, 0)))
    w_pad = jnp.pad(w.reshape(C_OUT, K_RAW).astype(jnp.bfloat16),
                    ((0, 0), (0, K_PAD - K_RAW)))
    b_col = b.reshape(C_OUT, 1).astype(jnp.float32)

    # 2-way split over M so both v7x TensorCores get work (cheap loop on
    # single-TC chips); fall back to 1 block if M is not nicely divisible.
    n_blocks = 2 if (M_total % (2 * 128) == 0) else 1
    m_blk = M_total // n_blocks

    y = pl.pallas_call(
        _i3d_stem_kernel,
        out_shape=jax.ShapeDtypeStruct((C_OUT, M_total), jnp.float32),
        grid=(n_blocks,),
        in_specs=[
            pl.BlockSpec((C_OUT, K_PAD), lambda m: (0, 0)),
            pl.BlockSpec((C_OUT, 1), lambda m: (0, 0)),
            pl.BlockSpec((K_PAD, m_blk), lambda m: (0, m)),
        ],
        out_specs=pl.BlockSpec((C_OUT, m_blk), lambda m: (0, m)),
        compiler_params=pltpu.CompilerParams(
            dimension_semantics=("parallel",)),
    )(w_pad, b_col, patch_t)

    # lane-dense (C_OUT, Nt*P) -> PyTorch NCTHW feamap + pooled feature.
    feamap = y.reshape(C_OUT, Nt, To, Ho, Wo).transpose(1, 0, 2, 3, 4)
    feature = y.reshape(C_OUT, Nt, P).mean(axis=-1).T   # (Nt, C_OUT)
    return feamap, feature


def backbone_forward(video_12, w, b, action_number_choosing=True):
    """Reproduces backbone.forward from models/I3D_TSA_baseline.py."""
    start_idx = list(range(0, 90, 10))          # 9 clips of 16 frames
    n_clips = len(start_idx)

    if action_number_choosing:
        video_1, video_2 = video_12
        total_video = jnp.concatenate((video_1, video_2), axis=0)
    else:
        total_video = video_12

    video_pack = jnp.concatenate(
        [total_video[:, :, i:i + 16] for i in start_idx], axis=0)

    total_feamap, total_feature = i3d_forward(video_pack, w, b)
    Nt, C, T, H, W = total_feamap.shape
    n_vid = total_video.shape[0]

    total_feature = jnp.swapaxes(
        total_feature.reshape(n_clips, n_vid, -1), 0, 1)
    total_feamap = jnp.swapaxes(
        total_feamap.reshape(n_clips, n_vid, C, T, H, W), 0, 1)

    Batch_size, Clips, Channels, Times, Height, Width = total_feamap.shape
    cls_feamap = total_feamap.reshape(
        Batch_size, Channels, Times * Clips, Height, Width)

    if action_number_choosing:
        half_f = total_feature.shape[0] // 2
        half_m = total_feamap.shape[0] // 2
        feature_1 = total_feature[:half_f]
        feature_2 = total_feature[half_f:]
        feamap_1 = total_feamap[:half_m]
        feamap_2 = total_feamap[half_m:]
        return feature_1, feature_2, feamap_1, feamap_2, cls_feamap
    else:
        return total_feature, total_feamap, cls_feamap


if __name__ == "__main__":
    key = jax.random.PRNGKey(0)
    k_v1, k_v2, k_w, k_b = jax.random.split(key, 4)

    # forward slices frames [0:96] -> each input video needs T >= 96
    video_1 = jax.random.normal(k_v1, (1, C_IN, 96, 16, 16), dtype=jnp.float32)
    video_2 = jax.random.normal(k_v2, (1, C_IN, 96, 16, 16), dtype=jnp.float32)

    # deterministic synthetic I3D-stem parameters
    w = 0.05 * jax.random.normal(
        k_w, (C_OUT, C_IN, KSIZE, KSIZE, KSIZE), dtype=jnp.float32)
    b = 0.01 * jax.random.normal(k_b, (C_OUT,), dtype=jnp.float32)

    outs = backbone_forward((video_1, video_2), w, b,
                            action_number_choosing=True)
    outs = jax.block_until_ready(outs)

    feature_1, feature_2, feamap_1, feamap_2, cls_feamap_12 = outs
    assert feature_1.shape == (1, 9, C_OUT)
    assert feature_2.shape == (1, 9, C_OUT)
    assert feamap_1.shape == (1, 9, C_OUT, 8, 8, 8)
    assert feamap_2.shape == (1, 9, C_OUT, 8, 8, 8)
    assert cls_feamap_12.shape == (2, C_OUT, 8 * 9, 8, 8)

    print("KERNEL_OK")
</pallas_src>

<mosaic_0001>
module attributes {stable_mosaic.version = 11 : i64} {
  func.func @_i3d_stem_kernel(%arg0: i32, %arg1: memref<16x128xbf16, #tpu.memory_space<vmem>>, %arg2: memref<16x1xf32, #tpu.memory_space<vmem>>, %arg3: memref<128x4608xbf16, #tpu.memory_space<vmem>>, %arg4: memref<16x4608xf32, #tpu.memory_space<vmem>>) attributes {dimension_semantics = [#tpu.dimension_semantics<parallel>], iteration_bounds = array<i64: 2>, scalar_prefetch = 0 : i64, scratch_operands = 0 : i64, tpu.core_type = #tpu.core_type<tc>, window_params = [{pipeline_mode = #tpu.pipeline_mode<synchronous>, transform_indices = @transform_0, window_bounds = array<i64: 16, 128>}, {pipeline_mode = #tpu.pipeline_mode<synchronous>, transform_indices = @transform_1, window_bounds = array<i64: 16, 1>}, {transform_indices = @transform_2, window_bounds = array<i64: 128, 4608>}, {transform_indices = @transform_3, window_bounds = array<i64: 16, 4608>}]} {
    %c0 = arith.constant 0 : index
    %c0_0 = arith.constant 0 : index
    %0 = vector.load %arg1[%c0, %c0_0] : memref<16x128xbf16, #tpu.memory_space<vmem>>, vector<16x128xbf16>
    %c0_1 = arith.constant 0 : index
    %c0_2 = arith.constant 0 : index
    %1 = vector.load %arg3[%c0_1, %c0_2] : memref<128x4608xbf16, #tpu.memory_space<vmem>>, vector<128x4608xbf16>
    %cst = arith.constant dense<0.000000e+00> : vector<16x4608xf32>
    %2 = tpu.matmul %0, %1, %cst {dimension_numbers = #tpu.dot_dimension_numbers<[1], [0], [0], [1], [0, 0, 1, 1], [], []>} : vector<16x128xbf16>, vector<128x4608xbf16>, vector<16x4608xf32> -> vector<16x4608xf32>
    %c0_3 = arith.constant 0 : index
    %c0_4 = arith.constant 0 : index
    %3 = vector.load %arg2[%c0_3, %c0_4] : memref<16x1xf32, #tpu.memory_space<vmem>>, vector<16x1xf32>
    %4 = vector.broadcast %3 : vector<16x1xf32> to vector<16x4608xf32>
    %5 = arith.addf %2, %4 : vector<16x4608xf32>
    %cst_5 = arith.constant 0.000000e+00 : f32
    %6 = vector.broadcast %cst_5 : f32 to vector<16x4608xf32>
    %7 = arith.maximumf %5, %6 : vector<16x4608xf32>
    %c0_6 = arith.constant 0 : index
    %c0_7 = arith.constant 0 : index
    %8 = vector.load %arg4[%c0_6, %c0_7] : memref<16x4608xf32, #tpu.memory_space<vmem>>, vector<16x4608xf32>
    tpu.vector_store %arg4[%c0_6, %c0_7], %7 {strides = array<i32>} : memref<16x4608xf32, #tpu.memory_space<vmem>>, vector<16x4608xf32>,
    return
  }
  func.func @transform_0(%arg0: i32) -> (i32, i32) {
    %c0_i32 = arith.constant 0 : i32
    %c0_i32_0 = arith.constant 0 : i32
    %c0_i32_1 = arith.constant 0 : i32
    return %c0_i32, %c0_i32_0 : i32, i32
  }
  func.func @transform_1(%arg0: i32) -> (i32, i32) {
    %c0_i32 = arith.constant 0 : i32
    %c0_i32_0 = arith.constant 0 : i32
    %c0_i32_1 = arith.constant 0 : i32
    return %c0_i32, %c0_i32_0 : i32, i32
  }
  func.func @transform_2(%arg0: i32) -> (i32, i32) {
    %c0_i32 = arith.constant 0 : i32
    %c0_i32_0 = arith.constant 0 : i32
    return %c0_i32, %arg0 : i32, i32
  }
  func.func @transform_3(%arg0: i32) -> (i32, i32) {
    %c0_i32 = arith.constant 0 : i32
    %c0_i32_0 = arith.constant 0 : i32
    return %c0_i32, %arg0 : i32, i32
  }
}

</mosaic_0001>

<bundles_post_ra>
// kernel: tpu_custom_call.1
= control target key start
LH: loop header
LB: loop body
LE: loop exit
PB: predicated region body
PF: predicated region fallthrough
CT: control target
= control target key end

     0   :  { %8 = vsyncpa [#allocation3], 0  ;;  %s4630_s0 = inlined_call_operand.hbm [shape: bf16[16,128], index: 0, kind: input, shape index: {}]   ;;  %s4631_s1 = inlined_call_operand.vmem [shape: f32[16,1], index: 1, kind: input, shape index: {}]   ;;  %s4632_s2 = inlined_call_operand.hbm [shape: bf16[128,9216], index: 2, kind: input, shape index: {}]   ;;  %s4633_s3 = inlined_call_operand.hbm [shape: f32[16,9216], index: 3, kind: output, shape index: {}]  }
   0x1   :  { %9 = vsyncpa [#allocation6], 0 }
   0x2   :  { %11 = vsyncpa [#allocation6 + $0x1], 0 }
   0x3   :  { %12 = vsyncpa [#allocation4], 0 }
   0x4   :  { %14 = vsyncpa [#allocation4 + $0x1], 0  ;;  %s3939_s12 = smov 0   ;;  %s3941_s13 = smov 0  }
   0x5   :  { %s3943_s14 = smov 0   ;;  %s3945_s15 = smov 0  }
   0x6 LB: > { %s3960_s16 = sadd.s32 4294967295, %s3905_s15   ;;  %s2972_s17 = sadd.s32 4294967294, %s3905_s15   ;;  %s3905_s15 = sphi %s3945_s15, %s4657_s15   ;;  %s3901_s14 = sphi %s3943_s14, %s4656_s14   ;;  %s3897_s13 = sphi %s3941_s13, %s4655_s13   ;;  %s3893_s12 = sphi %s3939_s12, %s4654_s12  }
   0x7   : > { %s3964_s18 = sadd.s32 1, %s3905_s15   ;;  %s69_s19 = sadd.s32 1, %s3901_s14 }
   0x8   : > { %s66_s20 = ssub.s32 %s3905_s15, %s3964_s18  ;;  %p76_p0 = scmp.ne.s32.totalorder %s3901_s14, %s3897_s13 }
   0x9   : > { %p67_p1 = scmp.eq.s32.totalorder %s66_s20, 0  ;;  %p77_p2 = scmp.eq.s32.totalorder %s3905_s15, 0 }
   0xa   : > { %p82_p3 = scmp.ne.s32.totalorder %s3897_s13, %s3893_s12  ;;  %p4634_p4 = scmp.eq.s32.totalorder %s3960_s16, 0 }
   0xb   : > { %s3976_s21 = scalar_select %p67_p1, %s3901_s14, %s69_s19  }
   0xc   : > { %p3978_p5 = por %p77_p2, %p76_p0  ;;  %p3984_p6 = por %p4634_p4, %p82_p3 }
   0xd   : > { %p106_p7 = scmp.eq.s32.totalorder %s3960_s16, 1  ;;  %p112_p8 = scmp.eq.s32.totalorder %s2972_s17, 1 }
   0xe   : > { %s4638_s22 = scalar_select %p3978_p5, 1, 0 }
   0xf   : > { %s4639_s23 = scalar_select %p3984_p6, 1, 0 }
  0x10   : > { %p2973_p9 = scmp.ge.s32.totalorder %s3905_s15, 1  ;;  %p119_p10 = scmp.lt.s32.totalorder %s3905_s15, 3 }
  0x11   : > { %p3991_p11 = por %p106_p7, %p76_p0  ;;  %p3995_p12 = por %p112_p8, %p82_p3 }
  0x12   : > { %p3999_p13 = pnand %p2973_p9, %p119_p10  ;;  %s3907_s27 = smov [#allocation2]  }
  0x13   : > { %s4640_s24 = scalar_select %p3991_p11, 1, 0 }
  0x14   : > { %s4641_s25 = scalar_select %p3995_p12, 1, 0 }
  0x15   : > { %s4642_s26 = scalar_select %p3999_p13, 1, 0 }
  0x16   : > { %p3284_p1 = pneg %p3999_p13  ;;  %s131_s28 = sshll.u32 %s3907_s27, 4  ;;  %s132_s28 = int_to_ptr.vmem [resolvable:$true] %s131_s28 }
  0x17   : > { %s148_s30 = sand.u32 1, %s3901_s14   ;;  %s3777_s6 = scalar_lea.hbm %s4630_s0, 128 }
  0x18   : > { %p4007_p2 = pnand %p3284_p1, %p4634_p4  ;;  %p3778_p7 = scmp.ne.s32.totalorder %s4630_s0, %s3777_s6 }
  0x19   : > { %p3784_p1 = scmp.lt.u32.totalorder %s3777_s6, %s4630_s0 }
  0x1a   : > { %p3779_p8 = pneg %p4007_p2 }
  0x1c   : > { %p3780_p9 = pnand %p3779_p8, %p3778_p7 }
  0x1e   : > { %p3781_p10 = pneg %p3780_p9 }
  0x20   : > { %p3786_p4 = pnand %p3784_p1, %p3781_p10 }
  0x22   : > { %3789 = shalt.err (!%p3786_p4)
}
  0x23   : > { %s3790_s11 = scalar_lea.vmem %s132_s28, 128  ;;  %p3798_p11 = scmp.lt.s32.totalorder %s132_s28, %s132_s28 }
  0x24   : > { %p3791_p0 = scmp.ne.s32.totalorder %s132_s28, %s3790_s11  ;;  %p3799_p6 = scmp.lt.s32.totalorder %s3790_s11, %s3790_s11 }
  0x26   : > { %p3793_p3 = pnand %p3791_p0, %p3779_p8  ;;  %p3800_p13 = por %p3799_p6, %p3798_p11 }
  0x28   : > { %p3794_p12 = pneg %p3793_p3 }
  0x2a   : > { %p3801_p5 = pnand %p3800_p13, %p3794_p12 }
  0x2c   : > { %3804 = shalt.err (!%p3801_p5)
}
  0x2d   : > { %s3908_s17 = smov 64   ;;  %s3909_s19 = smov 4  }
  0x2e   : > { %3287 = dma.hbm_to_vmem [thread:$0]  (!%p4007_p2), %s4630_s0, 128, %s132_s28, [#allocation3], %s3908_s17, %s3908_s17, %s3909_s19  }
  0x2f   : > { %p4644_p4 = scmp.ne.s32.totalorder %s4638_s22, 0  ;;  %p4645_p7 = scmp.lt.s32.totalorder %s3905_s15, 2 }
  0x30   : > { %s3273_s5 = smul.u32 2304, %s148_s30  ;;  %s4046_s29 = scalar_lea.sflag [#allocation6], %s148_s30 }
  0x31   : > { %p4034_p0 = pnand %p4645_p7, %p4644_p4  ;;  %s3271_s6 = smul.u32 2304, %s3905_s15 }
  0x32   : > { %s152_s28 = scalar_lea.vmem [#allocation5], %s3273_s5  ;;  %s3810_s19 = scalar_lea.hbm %s4632_s2, 73728 }
  0x33   : > { %s4042_s9 = scalar_lea.hbm %s4632_s2, %s3271_s6  ;;  %s159_s22 = sshll.u32 %s152_s28, 4  ;;  %s4044_s22 = int_to_ptr.vmem [resolvable:$true] %s159_s22 }
  0x34   : > { %s3805_s10 = scalar_lea.hbm %s4042_s9, 36864  ;;  %p3807_p6 = pneg %p4034_p0 }
  0x35   : > { %p3806_p5 = scmp.ne.s32.totalorder %s4042_s9, %s3805_s10  ;;  %p3811_p13 = scmp.lt.u32.totalorder %s4042_s9, %s4632_s2 }
  0x36   : > { %p3812_p2 = scmp.lt.u32.totalorder %s3810_s19, %s3805_s10  ;;  %p3814_p8 = scmp.lt.u32.totalorder %s3805_s10, %s4042_s9 }
  0x37   : > { %p3808_p11 = pnand %p3807_p6, %p3806_p5 }
  0x38   : > { %p3813_p3 = por %p3812_p2, %p3811_p13 }
  0x39   : > { %p3809_p12 = pneg %p3808_p11 }
  0x3a   : > { %p3815_p9 = por %p3814_p8, %p3813_p3 }
  0x3c   : > { %p3816_p10 = pnand %p3815_p9, %p3809_p12 }
  0x3e   : > { %3819 = shalt.err (!%p3816_p10)
}
  0x3f   : > { %s3820_s30 = scalar_lea.vmem %s4044_s22, 36864  ;;  %s3910_s5 = smov [#allocation5]  }
  0x40   : > { %p3821_p1 = scmp.ne.s32.totalorder %s4044_s22, %s3820_s30  ;;  %s3825_s6 = sshll.u32 %s3910_s5, 4  ;;  %s3826_s6 = int_to_ptr.vmem [resolvable:$false] %s3825_s6 }
  0x41   : > { %s3827_s7 = scalar_lea.vmem %s3826_s6, 73728  ;;  %p3828_p5 = scmp.lt.s32.totalorder %s4044_s22, %s3826_s6 }
  0x42   : > { %p3823_p4 = pnand %p3821_p1, %p3807_p6  ;;  %p3829_p11 = scmp.lt.s32.totalorder %s3827_s7, %s3820_s30 }
  0x44   : > { %p3824_p7 = pneg %p3823_p4  ;;  %p3830_p13 = por %p3829_p11, %p3828_p5 }
  0x46   : > { %p3831_p2 = pnand %p3830_p13, %p3824_p7 }
  0x48   : > { %3834 = shalt.err (!%p3831_p2)
}
  0x49   : > { %s3911_s8 = smov 4608   ;;  %s3912_s28 = smov 2304  }
  0x4a   : > { %s3913_s10 = smov 144   ;;  %p4647_p6 = scmp.ne.s32.totalorder %s4642_s26, 0 }
  0x4b   : > { %3291 = dma.hbm_to_vmem [thread:$0]  (!%p4034_p0), %s4042_s9, 36864, %s4044_s22, %s4046_s29, %s3911_s8, %s3912_s28, %s3913_s10  }
  0x4c   : > { %171 = sbr.rel (%p4647_p6) target bundleno = 615 (0x267), region = 32  ;;  %p4648_p12 = scmp.eq.s32.totalorder (!%p4647_p6), %s3960_s16, 0 }
  0x53   : > { %3880 = dma.done.wait (%p4648_p12), [#allocation3], 128   ;;  %p4649_p3 = pmov %p4648_p12 }
  0x54   : > { %s4081_s11 = sand.u32 1, %s3897_s13   ;;  %p4650_p0 = scmp.ne.s32.totalorder %s4639_s23, 0 }
  0x55   : > { %3882 = vsyncadd (%p4649_p3), [#allocation3], 4294967168  ;;  %s3274_s17 = smul.u32 2304, %s4081_s11  ;;  %s178_s19 = scalar_lea.sflag [#allocation6], %s4081_s11 }
  0x57   : > { %s4085_s20 = scalar_lea.vmem [#allocation5], %s3274_s17 }
  0x58   : > { %3884 = dma.done.wait (%p4650_p0), %s178_s19, 36864  }
  0x59   : > { %3886 = vsyncadd (%p4650_p0), %s178_s19, 4294930432  ;;  %v3914_v0 = vmov 0   ;;  %v3343_v1 = vld [vmem:[%s4085_s20 + $0x4] ss:$144 sps:$4 sm:$0xff]   ;;  %v3345_v2 = vld [vmem:[%s4085_s20 + $0xc] ss:$144 sps:$4 sm:$0xff]  }
  0x5a   : > { %1987 = vmatprep.mubr.bf16.mxu0 %v3914_v0  ;;  %2030 = vmatprep.mubr.bf16.mxu1 %v3914_v0  ;;  %v3347_v3 = vld [vmem:[%s4085_s20] ss:$144 sps:$4 sm:$0xff]   ;;  %v3348_v4 = vld [vmem:[%s4085_s20 + $0x8] ss:$144 sps:$4 sm:$0xff]   ;;  %v3349_v5 = vld [vmem:[%s4085_s20 + $0x124] ss:$144 sps:$4 sm:$0xff]  }
  0x5b   : > { %3342 = vset.pattern.permute.xlu0 %v3914_v0  ;;  %1955 = vmatprep.subr.bf16.mxu0 %v3343_v1  ;;  %v3351_v6 = vld [vmem:[%s4085_s20 + $0x12c] ss:$144 sps:$4 sm:$0xff]   ;;  %v3353_v7 = vld [vmem:[%s4085_s20 + $0x120] ss:$144 sps:$4 sm:$0xff]   ;;  %v3354_v8 = vld [vmem:[%s4085_s20 + $0x128] ss:$144 sps:$4 sm:$0xff]  }
  0x5c   : > { %1998 = vmatprep.subr.bf16.mxu1 %v3345_v2  ;;  %1956 = vmatpush1.bf16.msra.mxu0 %v3347_v3  ;;  %v3355_v9 = vld [vmem:[%s4085_s20 + $0x244] ss:$144 sps:$4 sm:$0xff]   ;;  %v3357_v10 = vld [vmem:[%s4085_s20 + $0x24c] ss:$144 sps:$4 sm:$0xff]   ;;  %v3359_v11 = vld [vmem:[%s4085_s20 + $0x240] ss:$144 sps:$4 sm:$0xff]  }
  0x5d   : > { %1999 = vmatpush1.bf16.msra.mxu1 %v3348_v4  ;;  %1957 = vmatprep.subr.bf16.mxu0 %v3349_v5  ;;  %v3360_v12 = vld [vmem:[%s4085_s20 + $0x248] ss:$144 sps:$4 sm:$0xff]   ;;  %v3361_v13 = vld [vmem:[%s4085_s20 + $0x364] ss:$144 sps:$4 sm:$0xff]   ;;  %v3363_v14 = vld [vmem:[%s4085_s20 + $0x36c] ss:$144 sps:$4 sm:$0xff]  }
  0x5e   : > { %2000 = vmatprep.subr.bf16.mxu1 %v3351_v6  ;;  %v3365_v15 = vld [vmem:[%s4085_s20 + $0x360] ss:$144 sps:$4 sm:$0xff]   ;;  %v3366_v16 = vld [vmem:[%s4085_s20 + $0x368] ss:$144 sps:$4 sm:$0xff]   ;;  %v3367_v17 = vld [vmem:[%s4085_s20 + $0x484] ss:$144 sps:$4 sm:$0xff]  }
  0x5f   : > { %v3369_v18 = vld [vmem:[%s4085_s20 + $0x48c] ss:$144 sps:$4 sm:$0xff]   ;;  %v3371_v19 = vld [vmem:[%s4085_s20 + $0x480] ss:$144 sps:$4 sm:$0xff]   ;;  %v3372_v20 = vld [vmem:[%s4085_s20 + $0x488] ss:$144 sps:$4 sm:$0xff]  }
  0x60   : > { %1958 = vmatpush1.bf16.msra.mxu0 %v3353_v7  ;;  %v3373_v21 = vld [vmem:[%s4085_s20 + $0x5a4] ss:$144 sps:$4 sm:$0xff]   ;;  %v3375_v22 = vld [vmem:[%s4085_s20 + $0x5ac] ss:$144 sps:$4 sm:$0xff]   ;;  %v3377_v23 = vld [vmem:[%s4085_s20 + $0x5a0] ss:$144 sps:$4 sm:$0xff]  }
  0x61   : > { %2001 = vmatpush1.bf16.msra.mxu1 %v3354_v8  ;;  %1959 = vmatprep.subr.bf16.mxu0 %v3355_v9  ;;  %v3378_v24 = vld [vmem:[%s4085_s20 + $0x5a8] ss:$144 sps:$4 sm:$0xff]   ;;  %v3379_v25 = vld [vmem:[%s4085_s20 + $0x6c4] ss:$144 sps:$4 sm:$0xff]   ;;  %v3381_v26 = vld [vmem:[%s4085_s20 + $0x6cc] ss:$144 sps:$4 sm:$0xff]  }
  0x62   : > { %2002 = vmatprep.subr.bf16.mxu1 %v3357_v10  ;;  %v3383_v27 = vld [vmem:[%s4085_s20 + $0x6c0] ss:$144 sps:$4 sm:$0xff]   ;;  %v3384_v28 = vld [vmem:[%s4085_s20 + $0x6c8] ss:$144 sps:$4 sm:$0xff]   ;;  %v3385_v29 = vld [vmem:[%s4085_s20 + $0x7e4] ss:$144 sps:$4 sm:$0xff]  }
  0x63   : > { %v3387_v30 = vld [vmem:[%s4085_s20 + $0x7ec] ss:$144 sps:$4 sm:$0xff]   ;;  %v3389_v31 = vld [vmem:[%s4085_s20 + $0x7e0] ss:$144 sps:$4 sm:$0xff]   ;;  %v3390_v32 = vld [vmem:[%s4085_s20 + $0x7e8] ss:$144 sps:$4 sm:$0xff]  }
  0x64   : > { %1960 = vmatpush1.bf16.msra.mxu0 %v3359_v11  ;;  %v3394_v33 = vld [vmem:[%s4085_s20 + $0x14] ss:$144 sps:$4 sm:$0xff]   ;;  %v3397_v34 = vld [vmem:[%s4085_s20 + $0x1c] ss:$144 sps:$4 sm:$0xff]   ;;  %v3392_v36 = vld [vmem:[%s4085_s20 + $0x10] ss:$144 sps:$4 sm:$0xff]  }
  0x65   : > { %2003 = vmatpush1.bf16.msra.mxu1 %v3360_v12  ;;  %1961 = vmatprep.subr.bf16.mxu0 %v3361_v13  ;;  %v4128_v35 = vld [vmem:[#allocation2] sm:$0xff]   ;;  %v3400_v38 = vld [vmem:[%s4085_s20 + $0x134] ss:$144 sps:$4 sm:$0xff]   ;;  %v3398_v40 = vld [vmem:[%s4085_s20 + $0x130] ss:$144 sps:$4 sm:$0xff]   ;;  %s3275_s22 = smul.u32 576, %s4081_s11 }
  0x66   : > { %2004 = vmatprep.subr.bf16.mxu1 %v3363_v14  ;;  %v3395_v37 = vld [vmem:[%s4085_s20 + $0x18] ss:$144 sps:$4 sm:$0xff]   ;;  %v3403_v39 = vld [vmem:[%s4085_s20 + $0x13c] ss:$144 sps:$4 sm:$0xff]   ;;  %v3406_v42 = vld [vmem:[%s4085_s20 + $0x254] ss:$144 sps:$4 sm:$0xff]  }
  0x67   : > { %v3401_v41 = vld [vmem:[%s4085_s20 + $0x138] ss:$144 sps:$4 sm:$0xff]   ;;  %v3409_v43 = vld [vmem:[%s4085_s20 + $0x25c] ss:$144 sps:$4 sm:$0xff]   ;;  %v3404_v44 = vld [vmem:[%s4085_s20 + $0x250] ss:$144 sps:$4 sm:$0xff]  }
  0x68   : > { %1962 = vmatpush1.bf16.msra.mxu0 %v3365_v15  ;;  %v3407_v45 = vld [vmem:[%s4085_s20 + $0x258] ss:$144 sps:$4 sm:$0xff]   ;;  %v3412_v46 = vld [vmem:[%s4085_s20 + $0x374] ss:$144 sps:$4 sm:$0xff]   ;;  %v3415_v47 = vld [vmem:[%s4085_s20 + $0x37c] ss:$144 sps:$4 sm:$0xff]  }
  0x69   : > { %2005 = vmatpush1.bf16.msra.mxu1 %v3366_v16  ;;  %1963 = vmatprep.subr.bf16.mxu0 %v3367_v17  ;;  %v3410_v48 = vld [vmem:[%s4085_s20 + $0x370] ss:$144 sps:$4 sm:$0xff]   ;;  %v3413_v49 = vld [vmem:[%s4085_s20 + $0x378] ss:$144 sps:$4 sm:$0xff]   ;;  %v3418_v50 = vld [vmem:[%s4085_s20 + $0x494] ss:$144 sps:$4 sm:$0xff]  }
  0x6a   : > { %2006 = vmatprep.subr.bf16.mxu1 %v3369_v18  ;;  %v3421_v51 = vld [vmem:[%s4085_s20 + $0x49c] ss:$144 sps:$4 sm:$0xff]   ;;  %v3416_v52 = vld [vmem:[%s4085_s20 + $0x490] ss:$144 sps:$4 sm:$0xff]   ;;  %v3419_v53 = vld [vmem:[%s4085_s20 + $0x498] ss:$144 sps:$4 sm:$0xff]  }
  0x6b   : > { %v3424_v54 = vld [vmem:[%s4085_s20 + $0x5b4] ss:$144 sps:$4 sm:$0xff]   ;;  %v3427_v55 = vld [vmem:[%s4085_s20 + $0x5bc] ss:$144 sps:$4 sm:$0xff]   ;;  %v3422_v56 = vld [vmem:[%s4085_s20 + $0x5b0] ss:$144 sps:$4 sm:$0xff]  }
  0x6c   : > { %1964 = vmatpush1.bf16.msra.mxu0 %v3371_v19  ;;  %v3425_v57 = vld [vmem:[%s4085_s20 + $0x5b8] ss:$144 sps:$4 sm:$0xff]   ;;  %v3430_v58 = vld [vmem:[%s4085_s20 + $0x6d4] ss:$144 sps:$4 sm:$0xff]   ;;  %v3433_v59 = vld [vmem:[%s4085_s20 + $0x6dc] ss:$144 sps:$4 sm:$0xff]  }
  0x6d   : > { %2007 = vmatpush1.bf16.msra.mxu1 %v3372_v20  ;;  %1965 = vmatprep.subr.bf16.mxu0 %v3373_v21  ;;  %v3428_v60 = vld [vmem:[%s4085_s20 + $0x6d0] ss:$144 sps:$4 sm:$0xff]   ;;  %v3431_v61 = vld [vmem:[%s4085_s20 + $0x6d8] ss:$144 sps:$4 sm:$0xff]   ;;  %v3436_v62 = vld [vmem:[%s4085_s20 + $0x7f4] ss:$144 sps:$4 sm:$0xff]  }
  0x6e   : > { %2008 = vmatprep.subr.bf16.mxu1 %v3375_v22  ;;  %v3439_v63 = vld [vmem:[%s4085_s20 + $0x7fc] ss:$144 sps:$4 sm:$0xff]   ;;  %v3434_v1 = vld [vmem:[%s4085_s20 + $0x7f0] ss:$144 sps:$4 sm:$0xff]   ;;  %v3437_v2 = vld [vmem:[%s4085_s20 + $0x7f8] ss:$144 sps:$4 sm:$0xff]  }
  0x6f   : > { %v3442_v3 = vld [vmem:[%s4085_s20 + $0x24] ss:$144 sps:$4 sm:$0xff]   ;;  %v3445_v4 = vld [vmem:[%s4085_s20 + $0x2c] ss:$144 sps:$4 sm:$0xff]   ;;  %v3440_v5 = vld [vmem:[%s4085_s20 + $0x20] ss:$144 sps:$4 sm:$0xff]  }
  0x70   : > { %1966 = vmatpush1.bf16.msra.mxu0 %v3377_v23  ;;  %v3443_v6 = vld [vmem:[%s4085_s20 + $0x28] ss:$144 sps:$4 sm:$0xff]   ;;  %v3448_v7 = vld [vmem:[%s4085_s20 + $0x144] ss:$144 sps:$4 sm:$0xff]   ;;  %v3451_v8 = vld [vmem:[%s4085_s20 + $0x14c] ss:$144 sps:$4 sm:$0xff]  }
  0x71   : > { %2009 = vmatpush1.bf16.msra.mxu1 %v3378_v24  ;;  %1967 = vmatprep.subr.bf16.mxu0 %v3379_v25  ;;  %v3446_v9 = vld [vmem:[%s4085_s20 + $0x140] ss:$144 sps:$4 sm:$0xff]   ;;  %v3449_v10 = vld [vmem:[%s4085_s20 + $0x148] ss:$144 sps:$4 sm:$0xff]   ;;  %v3454_v11 = vld [vmem:[%s4085_s20 + $0x264] ss:$144 sps:$4 sm:$0xff]  }
  0x72   : > { %2010 = vmatprep.subr.bf16.mxu1 %v3381_v26  ;;  %v3457_v12 = vld [vmem:[%s4085_s20 + $0x26c] ss:$144 sps:$4 sm:$0xff]   ;;  %v3452_v13 = vld [vmem:[%s4085_s20 + $0x260] ss:$144 sps:$4 sm:$0xff]   ;;  %v3455_v14 = vld [vmem:[%s4085_s20 + $0x268] ss:$144 sps:$4 sm:$0xff]  }
  0x73   : > { %v3460_v15 = vld [vmem:[%s4085_s20 + $0x384] ss:$144 sps:$4 sm:$0xff]   ;;  %v3463_v16 = vld [vmem:[%s4085_s20 + $0x38c] ss:$144 sps:$4 sm:$0xff]   ;;  %v3458_v17 = vld [vmem:[%s4085_s20 + $0x380] ss:$144 sps:$4 sm:$0xff]  }
  0x74   : > { %1968 = vmatpush1.bf16.msra.mxu0 %v3383_v27  ;;  %v3461_v18 = vld [vmem:[%s4085_s20 + $0x388] ss:$144 sps:$4 sm:$0xff]   ;;  %v3466_v19 = vld [vmem:[%s4085_s20 + $0x4a4] ss:$144 sps:$4 sm:$0xff]   ;;  %v3469_v20 = vld [vmem:[%s4085_s20 + $0x4ac] ss:$144 sps:$4 sm:$0xff]  }
  0x75   : > { %2011 = vmatpush1.bf16.msra.mxu1 %v3384_v28  ;;  %1969 = vmatprep.subr.bf16.mxu0 %v3385_v29  ;;  %v497_v21 = vld [vmem:[%s4631_s1] sm:$0xff]  ;;  %v3464_v22 = vld [vmem:[%s4085_s20 + $0x4a0] ss:$144 sps:$4 sm:$0xff]   ;;  %v3472_v24 = vld [vmem:[%s4085_s20 + $0x5c4] ss:$144 sps:$4 sm:$0xff]   ;;  %s4401_s29 = scalar_lea.vmem [#allocation7], %s3275_s22 }
  0x76   : > { %2012 = vmatprep.subr.bf16.mxu1 %v3387_v30  ;;  %v3467_v23 = vld [vmem:[%s4085_s20 + $0x4a8] ss:$144 sps:$4 sm:$0xff]   ;;  %501 = vperm.xlu0 %3342, %v497_v21   ;;  %v3475_v25 = vld [vmem:[%s4085_s20 + $0x5cc] ss:$144 sps:$4 sm:$0xff]   ;;  %v498_v26 = vld [vmem:[%s4631_s1 + $0x8] sm:$0xff]  ;;  %s3272_s27 = smul.u32 4608, %s3960_s16 }
  0x77   : > { %v3470_v27 = vld [vmem:[%s4085_s20 + $0x5c0] ss:$144 sps:$4 sm:$0xff]   ;;  %v3473_v28 = vld [vmem:[%s4085_s20 + $0x5c8] ss:$144 sps:$4 sm:$0xff]   ;;  %v3478_v29 = vld [vmem:[%s4085_s20 + $0x6e4] ss:$144 sps:$4 sm:$0xff]  }
  0x78   : > { %1970 = vmatpush1.bf16.msra.mxu0 %v3389_v31  ;;  %v3481_v30 = vld [vmem:[%s4085_s20 + $0x6ec] ss:$144 sps:$4 sm:$0xff]   ;;  %v3476_v31 = vld [vmem:[%s4085_s20 + $0x6e0] ss:$144 sps:$4 sm:$0xff]   ;;  %s2887_s30 = sshll.u32 %s4401_s29, 4  ;;  %s4576_s6 = scalar_lea.hbm %s4633_s3, %s3272_s27  ;;  %s4580_s30 = int_to_ptr.vmem [resolvable:$true] %s2887_s30 }
  0x79   : > { %2013 = vmatpush1.bf16.msra.mxu1 %v3390_v32  ;;  %2041 = vmatprep.subr.bf16.mxu0 %v3394_v33  ;;  %v3479_v32 = vld [vmem:[%s4085_s20 + $0x6e8] ss:$144 sps:$4 sm:$0xff]   ;;  %v3484_v33 = vld [vmem:[%s4085_s20 + $0x804] ss:$144 sps:$4 sm:$0xff]   ;;  %v3554_v21 = vld [vmem:[%s4085_s20 + $0x3a0] ss:$144 sps:$4 sm:$0xff]  }
  0x7a   : > { %2084 = vmatprep.subr.bf16.mxu1 %v3397_v34  ;;  %506 = vperm.xlu0 %3342, %v498_v26   ;;  %v3487_v34 = vld [vmem:[%s4085_s20 + $0x80c] ss:$144 sps:$4 sm:$0xff]   ;;  %v3563_v26 = vld [vmem:[%s4085_s20 + $0x4c8] ss:$144 sps:$4 sm:$0xff]   ;;  %s2874_s7 = scalar_lea.sflag [#allocation4], %s4081_s11  ;;  %s3835_s8 = scalar_lea.vmem %s4580_s30, 9216 }
  0x7b   : > { %1988 = vmatmul.mubr.bf16.vlgmr.msra.gmra.mrb[0].mxu0 %v4128_v35  ;;  %p3836_p8 = scmp.ne.s32.totalorder %s4580_s30, %s3835_s8  ;;  %p4651_p9 = scmp.ne.s32.totalorder %s4640_s24, 0 }
  0x7c   : > { %2031 = vmatmul.mubr.bf16.vlgmr.msra.gmra.mrb[0].mxu1 %v4128_v35  ;;  %2042 = vmatpush1.bf16.msra.mxu0 %v3392_v36  ;;  %v3482_v36 = vld [vmem:[%s4085_s20 + $0x800] ss:$144 sps:$4 sm:$0xff]   ;;  %s3915_s28 = smov [#allocation7]  }
  0x7d   : > { %2085 = vmatpush1.bf16.msra.mxu1 %v3395_v37  ;;  %2043 = vmatprep.subr.bf16.mxu0 %v3400_v38  ;;  %v3485_v37 = vld [vmem:[%s4085_s20 + $0x808] ss:$144 sps:$4 sm:$0xff]   ;;  %v3490_v38 = vld [vmem:[%s4085_s20 + $0x34] ss:$144 sps:$4 sm:$0xff]   ;;  %p3837_p10 = pnand %p3836_p8, %p4651_p9  ;;  %s3839_s10 = sshll.u32 %s3915_s28, 4  ;;  %s3840_s10 = int_to_ptr.vmem [resolvable:$false] %s3839_s10 }
  0x7e   : > { %2086 = vmatprep.subr.bf16.mxu1 %v3403_v39  ;;  %2073 = vmatprep.mubr.bf16.mxu0 %v3914_v0  ;;  %v3493_v39 = vld [vmem:[%s4085_s20 + $0x3c] ss:$144 sps:$4 sm:$0xff]   ;;  %s3841_s17 = scalar_lea.vmem %s3840_s10, 18432  ;;  %p3842_p4 = scmp.lt.s32.totalorder %s4580_s30, %s3840_s10 }
  0x7f   : > { %2116 = vmatprep.mubr.bf16.mxu1 %v3914_v0  ;;  %p3838_p1 = pneg %p3837_p10  ;;  %p3843_p7 = scmp.lt.s32.totalorder %s3841_s17, %s3835_s8 }
  0x80   : > { %2044 = vmatpush1.bf16.msra.mxu0 %v3398_v40  ;;  %v3488_v40 = vld [vmem:[%s4085_s20 + $0x30] ss:$144 sps:$4 sm:$0xff]  }
  0x81   : > { %2087 = vmatpush1.bf16.msra.mxu1 %v3401_v41  ;;  %2045 = vmatprep.subr.bf16.mxu0 %v3406_v42  ;;  %v3491_v41 = vld [vmem:[%s4085_s20 + $0x38] ss:$144 sps:$4 sm:$0xff]   ;;  %v3496_v42 = vld [vmem:[%s4085_s20 + $0x154] ss:$144 sps:$4 sm:$0xff]   ;;  %p3844_p5 = por %p3843_p7, %p3842_p4 }
  0x82   : > { %2088 = vmatprep.subr.bf16.mxu1 %v3409_v43  ;;  %v3499_v43 = vld [vmem:[%s4085_s20 + $0x15c] ss:$144 sps:$4 sm:$0xff]  }
  0x83   : > { %p3845_p11 = pnand %p3844_p5, %p3838_p1 }
  0x84   : > { %2046 = vmatpush1.bf16.msra.mxu0 %v3404_v44  ;;  %v3494_v44 = vld [vmem:[%s4085_s20 + $0x150] ss:$144 sps:$4 sm:$0xff]  }
  0x85   : > { %2089 = vmatpush1.bf16.msra.mxu1 %v3407_v45  ;;  %2047 = vmatprep.subr.bf16.mxu0 %v3412_v46  ;;  %v3497_v45 = vld [vmem:[%s4085_s20 + $0x158] ss:$144 sps:$4 sm:$0xff]   ;;  %v3502_v46 = vld [vmem:[%s4085_s20 + $0x274] ss:$144 sps:$4 sm:$0xff]  }
  0x86   : > { %2090 = vmatprep.subr.bf16.mxu1 %v3415_v47  ;;  %v3505_v47 = vld [vmem:[%s4085_s20 + $0x27c] ss:$144 sps:$4 sm:$0xff]  }
  0x88   : > { %2048 = vmatpush1.bf16.msra.mxu0 %v3410_v48  ;;  %v3500_v48 = vld [vmem:[%s4085_s20 + $0x270] ss:$144 sps:$4 sm:$0xff]  }
  0x89   : > { %2091 = vmatpush1.bf16.msra.mxu1 %v3413_v49  ;;  %2049 = vmatprep.subr.bf16.mxu0 %v3418_v50  ;;  %v3503_v49 = vld [vmem:[%s4085_s20 + $0x278] ss:$144 sps:$4 sm:$0xff]   ;;  %v3508_v50 = vld [vmem:[%s4085_s20 + $0x394] ss:$144 sps:$4 sm:$0xff]  }
  0x8a   : > { %2092 = vmatprep.subr.bf16.mxu1 %v3421_v51  ;;  %v3511_v51 = vld [vmem:[%s4085_s20 + $0x39c] ss:$144 sps:$4 sm:$0xff]  }
  0x8c   : > { %2050 = vmatpush1.bf16.msra.mxu0 %v3416_v52  ;;  %v3506_v52 = vld [vmem:[%s4085_s20 + $0x390] ss:$144 sps:$4 sm:$0xff]  }
  0x8d   : > { %2093 = vmatpush1.bf16.msra.mxu1 %v3419_v53  ;;  %2051 = vmatprep.subr.bf16.mxu0 %v3424_v54  ;;  %v3509_v53 = vld [vmem:[%s4085_s20 + $0x398] ss:$144 sps:$4 sm:$0xff]   ;;  %v3514_v54 = vld [vmem:[%s4085_s20 + $0x4b4] ss:$144 sps:$4 sm:$0xff]  }
  0x8e   : > { %2094 = vmatprep.subr.bf16.mxu1 %v3427_v55  ;;  %v3517_v55 = vld [vmem:[%s4085_s20 + $0x4bc] ss:$144 sps:$4 sm:$0xff]  }
  0x90   : > { %2052 = vmatpush1.bf16.msra.mxu0 %v3422_v56  ;;  %v3512_v56 = vld [vmem:[%s4085_s20 + $0x4b0] ss:$144 sps:$4 sm:$0xff]  }
  0x91   : > { %2095 = vmatpush1.bf16.msra.mxu1 %v3425_v57  ;;  %2053 = vmatprep.subr.bf16.mxu0 %v3430_v58  ;;  %v3515_v57 = vld [vmem:[%s4085_s20 + $0x4b8] ss:$144 sps:$4 sm:$0xff]   ;;  %v3520_v58 = vld [vmem:[%s4085_s20 + $0x5d4] ss:$144 sps:$4 sm:$0xff]  }
  0x92   : > { %2096 = vmatprep.subr.bf16.mxu1 %v3433_v59  ;;  %v3523_v59 = vld [vmem:[%s4085_s20 + $0x5dc] ss:$144 sps:$4 sm:$0xff]  }
  0x94   : > { %2054 = vmatpush1.bf16.msra.mxu0 %v3428_v60  ;;  %v3518_v60 = vld [vmem:[%s4085_s20 + $0x5d0] ss:$144 sps:$4 sm:$0xff]  }
  0x95   : > { %2097 = vmatpush1.bf16.msra.mxu1 %v3431_v61  ;;  %2055 = vmatprep.subr.bf16.mxu0 %v3436_v62  ;;  %v3521_v61 = vld [vmem:[%s4085_s20 + $0x5d8] ss:$144 sps:$4 sm:$0xff]   ;;  %v3526_v62 = vld [vmem:[%s4085_s20 + $0x6f4] ss:$144 sps:$4 sm:$0xff]  }
  0x96   : > { %2098 = vmatprep.subr.bf16.mxu1 %v3439_v63  ;;  %v3529_v63 = vld [vmem:[%s4085_s20 + $0x6fc] ss:$144 sps:$4 sm:$0xff]  }
  0x98   : > { %2056 = vmatpush1.bf16.msra.mxu0 %v3434_v1  ;;  %v3524_v1 = vld [vmem:[%s4085_s20 + $0x6f0] ss:$144 sps:$4 sm:$0xff]  }
  0x99   : > { %2099 = vmatpush1.bf16.msra.mxu1 %v3437_v2  ;;  %2127 = vmatprep.subr.bf16.mxu0 %v3442_v3  ;;  %v3527_v2 = vld [vmem:[%s4085_s20 + $0x6f8] ss:$144 sps:$4 sm:$0xff]   ;;  %v3532_v3 = vld [vmem:[%s4085_s20 + $0x814] ss:$144 sps:$4 sm:$0xff]  }
  0x9a   : > { %2170 = vmatprep.subr.bf16.mxu1 %v3445_v4  ;;  %v3535_v4 = vld [vmem:[%s4085_s20 + $0x81c] ss:$144 sps:$4 sm:$0xff]  }
  0x9b   : > { %2074 = vmatmul.mubr.bf16.vlgmr.msra.gmra.mrb[4].mxu0 %v4128_v35 }
  0x9c   : > { %2117 = vmatmul.mubr.bf16.vlgmr.msra.gmra.mrb[4].mxu1 %v4128_v35  ;;  %2128 = vmatpush1.bf16.msra.mxu0 %v3440_v5  ;;  %v3530_v5 = vld [vmem:[%s4085_s20 + $0x810] ss:$144 sps:$4 sm:$0xff]  }
  0x9d   : > { %2171 = vmatpush1.bf16.msra.mxu1 %v3443_v6  ;;  %2129 = vmatprep.subr.bf16.mxu0 %v3448_v7  ;;  %v3533_v6 = vld [vmem:[%s4085_s20 + $0x818] ss:$144 sps:$4 sm:$0xff]   ;;  %v3538_v7 = vld [vmem:[%s4085_s20 + $0x44] ss:$144 sps:$4 sm:$0xff]  }
  0x9e   : > { %2172 = vmatprep.subr.bf16.mxu1 %v3451_v8  ;;  %2159 = vmatprep.mubr.bf16.mxu0 %v3914_v0  ;;  %v3541_v8 = vld [vmem:[%s4085_s20 + $0x4c] ss:$144 sps:$4 sm:$0xff]  }
  0x9f   : > { %2202 = vmatprep.mubr.bf16.mxu1 %v3914_v0 }
  0xa0   : > { %2130 = vmatpush1.bf16.msra.mxu0 %v3446_v9  ;;  %v3536_v9 = vld [vmem:[%s4085_s20 + $0x40] ss:$144 sps:$4 sm:$0xff]  }
  0xa1   : > { %2173 = vmatpush1.bf16.msra.mxu1 %v3449_v10  ;;  %2131 = vmatprep.subr.bf16.mxu0 %v3454_v11  ;;  %v3539_v10 = vld [vmem:[%s4085_s20 + $0x48] ss:$144 sps:$4 sm:$0xff]   ;;  %v3544_v11 = vld [vmem:[%s4085_s20 + $0x164] ss:$144 sps:$4 sm:$0xff]  }
  0xa2   : > { %2174 = vmatprep.subr.bf16.mxu1 %v3457_v12  ;;  %v3547_v12 = vld [vmem:[%s4085_s20 + $0x16c] ss:$144 sps:$4 sm:$0xff]  }
  0xa4   : > { %2132 = vmatpush1.bf16.msra.mxu0 %v3452_v13  ;;  %v3542_v13 = vld [vmem:[%s4085_s20 + $0x160] ss:$144 sps:$4 sm:$0xff]  }
  0xa5   : > { %2175 = vmatpush1.bf16.msra.mxu1 %v3455_v14  ;;  %2133 = vmatprep.subr.bf16.mxu0 %v3460_v15  ;;  %v3545_v14 = vld [vmem:[%s4085_s20 + $0x168] ss:$144 sps:$4 sm:$0xff]   ;;  %v3550_v15 = vld [vmem:[%s4085_s20 + $0x284] ss:$144 sps:$4 sm:$0xff]  }
  0xa6   : > { %2176 = vmatprep.subr.bf16.mxu1 %v3463_v16  ;;  %v3553_v16 = vld [vmem:[%s4085_s20 + $0x28c] ss:$144 sps:$4 sm:$0xff]  }
  0xa8   : > { %2134 = vmatpush1.bf16.msra.mxu0 %v3458_v17  ;;  %v3548_v17 = vld [vmem:[%s4085_s20 + $0x280] ss:$144 sps:$4 sm:$0xff]  }
  0xa9   : > { %2177 = vmatpush1.bf16.msra.mxu1 %v3461_v18  ;;  %2135 = vmatprep.subr.bf16.mxu0 %v3466_v19  ;;  %v3551_v18 = vld [vmem:[%s4085_s20 + $0x288] ss:$144 sps:$4 sm:$0xff]   ;;  %v3556_v19 = vld [vmem:[%s4085_s20 + $0x3a4] ss:$144 sps:$4 sm:$0xff]  }
  0xaa   : > { %2178 = vmatprep.subr.bf16.mxu1 %v3469_v20  ;;  %v3559_v20 = vld [vmem:[%s4085_s20 + $0x3ac] ss:$144 sps:$4 sm:$0xff]  }
  0xac   : > { %2136 = vmatpush1.bf16.msra.mxu0 %v3464_v22  ;;  %v3557_v22 = vld [vmem:[%s4085_s20 + $0x3a8] ss:$144 sps:$4 sm:$0xff]  }
  0xad   : > { %2179 = vmatpush1.bf16.msra.mxu1 %v3467_v23  ;;  %2137 = vmatprep.subr.bf16.mxu0 %v3472_v24  ;;  %v3562_v23 = vld [vmem:[%s4085_s20 + $0x4c4] ss:$144 sps:$4 sm:$0xff]   ;;  %v3565_v24 = vld [vmem:[%s4085_s20 + $0x4cc] ss:$144 sps:$4 sm:$0xff]  }
  0xae   : > { %2180 = vmatprep.subr.bf16.mxu1 %v3475_v25  ;;  %v3560_v25 = vld [vmem:[%s4085_s20 + $0x4c0] ss:$144 sps:$4 sm:$0xff]  }
  0xb0   : > { %2138 = vmatpush1.bf16.msra.mxu0 %v3470_v27  ;;  %v3568_v27 = vld [vmem:[%s4085_s20 + $0x5e4] ss:$144 sps:$4 sm:$0xff]  }
  0xb1   : > { %2181 = vmatpush1.bf16.msra.mxu1 %v3473_v28  ;;  %2139 = vmatprep.subr.bf16.mxu0 %v3478_v29  ;;  %v3571_v28 = vld [vmem:[%s4085_s20 + $0x5ec] ss:$144 sps:$4 sm:$0xff]   ;;  %v3566_v29 = vld [vmem:[%s4085_s20 + $0x5e0] ss:$144 sps:$4 sm:$0xff]  }
  0xb2   : > { %2182 = vmatprep.subr.bf16.mxu1 %v3481_v30  ;;  %v3569_v30 = vld [vmem:[%s4085_s20 + $0x5e8] ss:$144 sps:$4 sm:$0xff]  }
  0xb4   : > { %2140 = vmatpush1.bf16.msra.mxu0 %v3476_v31  ;;  %v3574_v31 = vld [vmem:[%s4085_s20 + $0x704] ss:$144 sps:$4 sm:$0xff]  }
  0xb5   : > { %2183 = vmatpush1.bf16.msra.mxu1 %v3479_v32  ;;  %2141 = vmatprep.subr.bf16.mxu0 %v3484_v33  ;;  %v3577_v32 = vld [vmem:[%s4085_s20 + $0x70c] ss:$144 sps:$4 sm:$0xff]   ;;  %v3572_v33 = vld [vmem:[%s4085_s20 + $0x700] ss:$144 sps:$4 sm:$0xff]  }
  0xb6   : > { %2184 = vmatprep.subr.bf16.mxu1 %v3487_v34  ;;  %v3575_v34 = vld [vmem:[%s4085_s20 + $0x708] ss:$144 sps:$4 sm:$0xff]  }
  0xb8   : > { %2142 = vmatpush1.bf16.msra.mxu0 %v3482_v36  ;;  %v3580_v36 = vld [vmem:[%s4085_s20 + $0x824] ss:$144 sps:$4 sm:$0xff]  }
  0xb9   : > { %2185 = vmatpush1.bf16.msra.mxu1 %v3485_v37  ;;  %2213 = vmatprep.subr.bf16.mxu0 %v3490_v38  ;;  %v3583_v37 = vld [vmem:[%s4085_s20 + $0x82c] ss:$144 sps:$4 sm:$0xff]   ;;  %v3578_v38 = vld [vmem:[%s4085_s20 + $0x820] ss:$144 sps:$4 sm:$0xff]  }
  0xba   : > { %2256 = vmatprep.subr.bf16.mxu1 %v3493_v39  ;;  %v3581_v39 = vld [vmem:[%s4085_s20 + $0x828] ss:$144 sps:$4 sm:$0xff]  }
  0xbb   : > { %2160 = vmatmul.mubr.bf16.vlgmr.msra.gmra.mrb[8].mxu0 %v4128_v35 }
  0xbc   : > { %2203 = vmatmul.mubr.bf16.vlgmr.msra.gmra.mrb[8].mxu1 %v4128_v35  ;;  %2214 = vmatpush1.bf16.msra.mxu0 %v3488_v40  ;;  %v3586_v40 = vld [vmem:[%s4085_s20 + $0x54] ss:$144 sps:$4 sm:$0xff]  }
  0xbd   : > { %2257 = vmatpush1.bf16.msra.mxu1 %v3491_v41  ;;  %2215 = vmatprep.subr.bf16.mxu0 %v3496_v42  ;;  %v3589_v41 = vld [vmem:[%s4085_s20 + $0x5c] ss:$144 sps:$4 sm:$0xff]   ;;  %v3584_v42 = vld [vmem:[%s4085_s20 + $0x50] ss:$144 sps:$4 sm:$0xff]  }
  0xbe   : > { %2258 = vmatprep.subr.bf16.mxu1 %v3499_v43  ;;  %2245 = vmatprep.mubr.bf16.mxu0 %v3914_v0  ;;  %v3587_v43 = vld [vmem:[%s4085_s20 + $0x58] ss:$144 sps:$4 sm:$0xff]  }
  0xbf   : > { %2288 = vmatprep.mubr.bf16.mxu1 %v3914_v0 }
  0xc0   : > { %2216 = vmatpush1.bf16.msra.mxu0 %v3494_v44  ;;  %v3592_v44 = vld [vmem:[%s4085_s20 + $0x174] ss:$144 sps:$4 sm:$0xff]  }
  0xc1   : > { %2259 = vmatpush1.bf16.msra.mxu1 %v3497_v45  ;;  %2217 = vmatprep.subr.bf16.mxu0 %v3502_v46  ;;  %v3595_v45 = vld [vmem:[%s4085_s20 + $0x17c] ss:$144 sps:$4 sm:$0xff]   ;;  %v3590_v46 = vld [vmem:[%s4085_s20 + $0x170] ss:$144 sps:$4 sm:$0xff]  }
  0xc2   : > { %2260 = vmatprep.subr.bf16.mxu1 %v3505_v47  ;;  %v3593_v47 = vld [vmem:[%s4085_s20 + $0x178] ss:$144 sps:$4 sm:$0xff]  }
  0xc4   : > { %2218 = vmatpush1.bf16.msra.mxu0 %v3500_v48  ;;  %v3598_v48 = vld [vmem:[%s4085_s20 + $0x294] ss:$144 sps:$4 sm:$0xff]  }
  0xc5   : > { %2261 = vmatpush1.bf16.msra.mxu1 %v3503_v49  ;;  %2219 = vmatprep.subr.bf16.mxu0 %v3508_v50  ;;  %v3601_v49 = vld [vmem:[%s4085_s20 + $0x29c] ss:$144 sps:$4 sm:$0xff]   ;;  %v3596_v50 = vld [vmem:[%s4085_s20 + $0x290] ss:$144 sps:$4 sm:$0xff]  }
  0xc6   : > { %2262 = vmatprep.subr.bf16.mxu1 %v3511_v51  ;;  %v3604_v51 = vld [vmem:[%s4085_s20 + $0x3b4] ss:$144 sps:$4 sm:$0xff]  }
  0xc8   : > { %2220 = vmatpush1.bf16.msra.mxu0 %v3506_v52  ;;  %v3607_v52 = vld [vmem:[%s4085_s20 + $0x3bc] ss:$144 sps:$4 sm:$0xff]  }
  0xc9   : > { %2263 = vmatpush1.bf16.msra.mxu1 %v3509_v53  ;;  %2221 = vmatprep.subr.bf16.mxu0 %v3514_v54  ;;  %v3602_v53 = vld [vmem:[%s4085_s20 + $0x3b0] ss:$144 sps:$4 sm:$0xff]   ;;  %v3605_v54 = vld [vmem:[%s4085_s20 + $0x3b8] ss:$144 sps:$4 sm:$0xff]  }
  0xca   : > { %2264 = vmatprep.subr.bf16.mxu1 %v3517_v55  ;;  %v3610_v55 = vld [vmem:[%s4085_s20 + $0x4d4] ss:$144 sps:$4 sm:$0xff]  }
  0xcc   : > { %2222 = vmatpush1.bf16.msra.mxu0 %v3512_v56  ;;  %v3613_v56 = vld [vmem:[%s4085_s20 + $0x4dc] ss:$144 sps:$4 sm:$0xff]  }
  0xcd   : > { %2265 = vmatpush1.bf16.msra.mxu1 %v3515_v57  ;;  %2223 = vmatprep.subr.bf16.mxu0 %v3520_v58  ;;  %v3608_v57 = vld [vmem:[%s4085_s20 + $0x4d0] ss:$144 sps:$4 sm:$0xff]   ;;  %v3611_v58 = vld [vmem:[%s4085_s20 + $0x4d8] ss:$144 sps:$4 sm:$0xff]  }
  0xce   : > { %2266 = vmatprep.subr.bf16.mxu1 %v3523_v59  ;;  %v3616_v59 = vld [vmem:[%s4085_s20 + $0x5f4] ss:$144 sps:$4 sm:$0xff]  }
  0xd0   : > { %2224 = vmatpush1.bf16.msra.mxu0 %v3518_v60  ;;  %v3619_v60 = vld [vmem:[%s4085_s20 + $0x5fc] ss:$144 sps:$4 sm:$0xff]  }
  0xd1   : > { %2267 = vmatpush1.bf16.msra.mxu1 %v3521_v61  ;;  %2225 = vmatprep.subr.bf16.mxu0 %v3526_v62  ;;  %v3614_v61 = vld [vmem:[%s4085_s20 + $0x5f0] ss:$144 sps:$4 sm:$0xff]   ;;  %v3617_v62 = vld [vmem:[%s4085_s20 + $0x5f8] ss:$144 sps:$4 sm:$0xff]  }
  0xd2   : > { %2268 = vmatprep.subr.bf16.mxu1 %v3529_v63  ;;  %v3622_v63 = vld [vmem:[%s4085_s20 + $0x714] ss:$144 sps:$4 sm:$0xff]  }
  0xd4   : > { %2226 = vmatpush1.bf16.msra.mxu0 %v3524_v1  ;;  %v3625_v1 = vld [vmem:[%s4085_s20 + $0x71c] ss:$144 sps:$4 sm:$0xff]  }
  0xd5   : > { %2269 = vmatpush1.bf16.msra.mxu1 %v3527_v2  ;;  %2227 = vmatprep.subr.bf16.mxu0 %v3532_v3  ;;  %v3620_v2 = vld [vmem:[%s4085_s20 + $0x710] ss:$144 sps:$4 sm:$0xff]   ;;  %v3623_v3 = vld [vmem:[%s4085_s20 + $0x718] ss:$144 sps:$4 sm:$0xff]  }
  0xd6   : > { %2270 = vmatprep.subr.bf16.mxu1 %v3535_v4  ;;  %v3628_v4 = vld [vmem:[%s4085_s20 + $0x834] ss:$144 sps:$4 sm:$0xff]  }
  0xd8   : > { %2228 = vmatpush1.bf16.msra.mxu0 %v3530_v5  ;;  %v3631_v5 = vld [vmem:[%s4085_s20 + $0x83c] ss:$144 sps:$4 sm:$0xff]  }
  0xd9   : > { %2271 = vmatpush1.bf16.msra.mxu1 %v3533_v6  ;;  %2299 = vmatprep.subr.bf16.mxu0 %v3538_v7  ;;  %v3626_v6 = vld [vmem:[%s4085_s20 + $0x830] ss:$144 sps:$4 sm:$0xff]   ;;  %v3629_v7 = vld [vmem:[%s4085_s20 + $0x838] ss:$144 sps:$4 sm:$0xff]  }
  0xda   : > { %2342 = vmatprep.subr.bf16.mxu1 %v3541_v8  ;;  %v3634_v8 = vld [vmem:[%s4085_s20 + $0x64] ss:$144 sps:$4 sm:$0xff]  }
  0xdb   : > { %2246 = vmatmul.mubr.bf16.vlgmr.msra.gmra.mrb[12].mxu0 %v4128_v35 }
  0xdc   : > { %2289 = vmatmul.mubr.bf16.vlgmr.msra.gmra.mrb[12].mxu1 %v4128_v35  ;;  %2300 = vmatpush1.bf16.msra.mxu0 %v3536_v9  ;;  %v3637_v9 = vld [vmem:[%s4085_s20 + $0x6c] ss:$144 sps:$4 sm:$0xff]  }
  0xdd   : > { %2343 = vmatpush1.bf16.msra.mxu1 %v3539_v10  ;;  %2301 = vmatprep.subr.bf16.mxu0 %v3544_v11  ;;  %v3632_v10 = vld [vmem:[%s4085_s20 + $0x60] ss:$144 sps:$4 sm:$0xff]   ;;  %v3635_v11 = vld [vmem:[%s4085_s20 + $0x68] ss:$144 sps:$4 sm:$0xff]  }
  0xde   : > { %2344 = vmatprep.subr.bf16.mxu1 %v3547_v12  ;;  %2331 = vmatprep.mubr.bf16.mxu0 %v3914_v0  ;;  %v3640_v12 = vld [vmem:[%s4085_s20 + $0x184] ss:$144 sps:$4 sm:$0xff]  }
  0xdf   : > { %2374 = vmatprep.mubr.bf16.mxu1 %v3914_v0 }
  0xe0   : > { %2302 = vmatpush1.bf16.msra.mxu0 %v3542_v13  ;;  %v3643_v13 = vld [vmem:[%s4085_s20 + $0x18c] ss:$144 sps:$4 sm:$0xff]  }
  0xe1   : > { %2345 = vmatpush1.bf16.msra.mxu1 %v3545_v14  ;;  %2303 = vmatprep.subr.bf16.mxu0 %v3550_v15  ;;  %v4320_v14 = vld [vmem:[#allocation2] sm:$0xff]   ;;  %v3638_v15 = vld [vmem:[%s4085_s20 + $0x180] ss:$144 sps:$4 sm:$0xff]  }
  0xe2   : > { %2346 = vmatprep.subr.bf16.mxu1 %v3553_v16  ;;  %v3641_v16 = vld [vmem:[%s4085_s20 + $0x188] ss:$144 sps:$4 sm:$0xff]  }
  0xe4   : > { %2304 = vmatpush1.bf16.msra.mxu0 %v3548_v17  ;;  %v3646_v17 = vld [vmem:[%s4085_s20 + $0x2a4] ss:$144 sps:$4 sm:$0xff]  }
  0xe5   : > { %2347 = vmatpush1.bf16.msra.mxu1 %v3551_v18  ;;  %2305 = vmatprep.subr.bf16.mxu0 %v3556_v19  ;;  %v3649_v18 = vld [vmem:[%s4085_s20 + $0x2ac] ss:$144 sps:$4 sm:$0xff]   ;;  %v3644_v19 = vld [vmem:[%s4085_s20 + $0x2a0] ss:$144 sps:$4 sm:$0xff]  }
  0xe6   : > { %2348 = vmatprep.subr.bf16.mxu1 %v3559_v20  ;;  %v3647_v20 = vld [vmem:[%s4085_s20 + $0x2a8] ss:$144 sps:$4 sm:$0xff]  }
  0xe8   : > { %2306 = vmatpush1.bf16.msra.mxu0 %v3554_v21  ;;  %v3652_v21 = vld [vmem:[%s4085_s20 + $0x3c4] ss:$144 sps:$4 sm:$0xff]  }
  0xe9   : > { %2349 = vmatpush1.bf16.msra.mxu1 %v3557_v22  ;;  %2307 = vmatprep.subr.bf16.mxu0 %v3562_v23  ;;  %v3655_v22 = vld [vmem:[%s4085_s20 + $0x3cc] ss:$144 sps:$4 sm:$0xff]   ;;  %v3650_v23 = vld [vmem:[%s4085_s20 + $0x3c0] ss:$144 sps:$4 sm:$0xff]  }
  0xea   : > { %2350 = vmatprep.subr.bf16.mxu1 %v3565_v24  ;;  %v3653_v24 = vld [vmem:[%s4085_s20 + $0x3c8] ss:$144 sps:$4 sm:$0xff]  }
  0xec   : > { %2308 = vmatpush1.bf16.msra.mxu0 %v3560_v25  ;;  %v3658_v25 = vld [vmem:[%s4085_s20 + $0x4e4] ss:$144 sps:$4 sm:$0xff]  }
  0xed   : > { %2351 = vmatpush1.bf16.msra.mxu1 %v3563_v26  ;;  %2309 = vmatprep.subr.bf16.mxu0 %v3568_v27  ;;  %v3661_v26 = vld [vmem:[%s4085_s20 + $0x4ec] ss:$144 sps:$4 sm:$0xff]   ;;  %v3656_v27 = vld [vmem:[%s4085_s20 + $0x4e0] ss:$144 sps:$4 sm:$0xff]  }
  0xee   : > { %2352 = vmatprep.subr.bf16.mxu1 %v3571_v28  ;;  %v3659_v28 = vld [vmem:[%s4085_s20 + $0x4e8] ss:$144 sps:$4 sm:$0xff]  }
  0xf0   : > { %2310 = vmatpush1.bf16.msra.mxu0 %v3566_v29  ;;  %v3664_v29 = vld [vmem:[%s4085_s20 + $0x604] ss:$144 sps:$4 sm:$0xff]  }
  0xf1   : > { %2353 = vmatpush1.bf16.msra.mxu1 %v3569_v30  ;;  %2311 = vmatprep.subr.bf16.mxu0 %v3574_v31  ;;  %v3667_v30 = vld [vmem:[%s4085_s20 + $0x60c] ss:$144 sps:$4 sm:$0xff]   ;;  %v3662_v31 = vld [vmem:[%s4085_s20 + $0x600] ss:$144 sps:$4 sm:$0xff]  }
  0xf2   : > { %2354 = vmatprep.subr.bf16.mxu1 %v3577_v32  ;;  %v3665_v32 = vld [vmem:[%s4085_s20 + $0x608] ss:$144 sps:$4 sm:$0xff]  }
  0xf4   : > { %2312 = vmatpush1.bf16.msra.mxu0 %v3572_v33  ;;  %v3670_v33 = vld [vmem:[%s4085_s20 + $0x724] ss:$144 sps:$4 sm:$0xff]  }
  0xf5   : > { %2355 = vmatpush1.bf16.msra.mxu1 %v3575_v34  ;;  %2313 = vmatprep.subr.bf16.mxu0 %v3580_v36  ;;  %v3673_v34 = vld [vmem:[%s4085_s20 + $0x72c] ss:$144 sps:$4 sm:$0xff]   ;;  %v3668_v36 = vld [vmem:[%s4085_s20 + $0x720] ss:$144 sps:$4 sm:$0xff]  }
  0xf6   : > { %2356 = vmatprep.subr.bf16.mxu1 %v3583_v37  ;;  %v3671_v37 = vld [vmem:[%s4085_s20 + $0x728] ss:$144 sps:$4 sm:$0xff]  }
  0xf8   : > { %2314 = vmatpush1.bf16.msra.mxu0 %v3578_v38  ;;  %v3676_v38 = vld [vmem:[%s4085_s20 + $0x844] ss:$144 sps:$4 sm:$0xff]  }
  0xf9   : > { %2357 = vmatpush1.bf16.msra.mxu1 %v3581_v39  ;;  %2385 = vmatprep.subr.bf16.mxu0 %v3586_v40  ;;  %v3679_v39 = vld [vmem:[%s4085_s20 + $0x84c] ss:$144 sps:$4 sm:$0xff]   ;;  %v3674_v40 = vld [vmem:[%s4085_s20 + $0x840] ss:$144 sps:$4 sm:$0xff]  }
  0xfa   : > { %2428 = vmatprep.subr.bf16.mxu1 %v3589_v41  ;;  %v3677_v41 = vld [vmem:[%s4085_s20 + $0x848] ss:$144 sps:$4 sm:$0xff]  }
  0xfb   : > { %2332 = vmatmul.mubr.bf16.vlgmr.msra.gmra.mrb[16].mxu0 %v4128_v35 }
  0xfc   : > { %2375 = vmatmul.mubr.bf16.vlgmr.msra.gmra.mrb[16].mxu1 %v4128_v35  ;;  %2386 = vmatpush1.bf16.msra.mxu0 %v3584_v42  ;;  %v3599_v35 = vld [vmem:[%s4085_s20 + $0x298] ss:$144 sps:$4 sm:$0xff]   ;;  %v3682_v42 = vld [vmem:[%s4085_s20 + $0x74] ss:$144 sps:$4 sm:$0xff]  }
  0xfd   : > { %2429 = vmatpush1.bf16.msra.mxu1 %v3587_v43  ;;  %2387 = vmatprep.subr.bf16.mxu0 %v3592_v44  ;;  %v3685_v43 = vld [vmem:[%s4085_s20 + $0x7c] ss:$144 sps:$4 sm:$0xff]   ;;  %v3680_v44 = vld [vmem:[%s4085_s20 + $0x70] ss:$144 sps:$4 sm:$0xff]  }
  0xfe   : > { %2430 = vmatprep.subr.bf16.mxu1 %v3595_v45  ;;  %2417 = vmatprep.mubr.bf16.mxu0 %v3914_v0  ;;  %v3683_v45 = vld [vmem:[%s4085_s20 + $0x78] ss:$144 sps:$4 sm:$0xff]  }
  0xff   : > { %2460 = vmatprep.mubr.bf16.mxu1 %v3914_v0 }
 0x100   : > { %2388 = vmatpush1.bf16.msra.mxu0 %v3590_v46  ;;  %v3688_v46 = vld [vmem:[%s4085_s20 + $0x194] ss:$144 sps:$4 sm:$0xff]  }
 0x101   : > { %2431 = vmatpush1.bf16.msra.mxu1 %v3593_v47  ;;  %2389 = vmatprep.subr.bf16.mxu0 %v3598_v48  ;;  %v3691_v47 = vld [vmem:[%s4085_s20 + $0x19c] ss:$144 sps:$4 sm:$0xff]   ;;  %v3686_v48 = vld [vmem:[%s4085_s20 + $0x190] ss:$144 sps:$4 sm:$0xff]  }
 0x102   : > { %2432 = vmatprep.subr.bf16.mxu1 %v3601_v49  ;;  %v3689_v49 = vld [vmem:[%s4085_s20 + $0x198] ss:$144 sps:$4 sm:$0xff]  }
 0x104   : > { %2390 = vmatpush1.bf16.msra.mxu0 %v3596_v50  ;;  %v3694_v50 = vld [vmem:[%s4085_s20 + $0x2b4] ss:$144 sps:$4 sm:$0xff]  }
 0x105   : > { %2433 = vmatpush1.bf16.msra.mxu1 %v3599_v35  ;;  %2391 = vmatprep.subr.bf16.mxu0 %v3604_v51  ;;  %v3697_v35 = vld [vmem:[%s4085_s20 + $0x2bc] ss:$144 sps:$4 sm:$0xff]   ;;  %v3692_v51 = vld [vmem:[%s4085_s20 + $0x2b0] ss:$144 sps:$4 sm:$0xff]  }
 0x106   : > { %2434 = vmatprep.subr.bf16.mxu1 %v3607_v52  ;;  %v3695_v52 = vld [vmem:[%s4085_s20 + $0x2b8] ss:$144 sps:$4 sm:$0xff]  }
 0x108   : > { %2392 = vmatpush1.bf16.msra.mxu0 %v3602_v53  ;;  %v3700_v53 = vld [vmem:[%s4085_s20 + $0x3d4] ss:$144 sps:$4 sm:$0xff]  }
 0x109   : > { %2435 = vmatpush1.bf16.msra.mxu1 %v3605_v54  ;;  %2393 = vmatprep.subr.bf16.mxu0 %v3610_v55  ;;  %v3703_v54 = vld [vmem:[%s4085_s20 + $0x3dc] ss:$144 sps:$4 sm:$0xff]   ;;  %v3698_v55 = vld [vmem:[%s4085_s20 + $0x3d0] ss:$144 sps:$4 sm:$0xff]  }
 0x10a   : > { %2436 = vmatprep.subr.bf16.mxu1 %v3613_v56  ;;  %v3701_v56 = vld [vmem:[%s4085_s20 + $0x3d8] ss:$144 sps:$4 sm:$0xff]  }
 0x10c   : > { %2394 = vmatpush1.bf16.msra.mxu0 %v3608_v57  ;;  %v3706_v57 = vld [vmem:[%s4085_s20 + $0x4f4] ss:$144 sps:$4 sm:$0xff]  }
 0x10d   : > { %2437 = vmatpush1.bf16.msra.mxu1 %v3611_v58  ;;  %2395 = vmatprep.subr.bf16.mxu0 %v3616_v59  ;;  %v3709_v58 = vld [vmem:[%s4085_s20 + $0x4fc] ss:$144 sps:$4 sm:$0xff]   ;;  %v4374_v59 = vpop.permute.xlu0 %501 }
 0x10e   : > { %2438 = vmatprep.subr.bf16.mxu1 %v3619_v60  ;;  %v3704_v60 = vld [vmem:[%s4085_s20 + $0x4f0] ss:$144 sps:$4 sm:$0xff]  }
 0x110   : > { %2396 = vmatpush1.bf16.msra.mxu0 %v3614_v61  ;;  %v3707_v61 = vld [vmem:[%s4085_s20 + $0x4f8] ss:$144 sps:$4 sm:$0xff]  }
 0x111   : > { %2439 = vmatpush1.bf16.msra.mxu1 %v3617_v62  ;;  %2397 = vmatprep.subr.bf16.mxu0 %v3622_v63  ;;  %v3712_v62 = vld [vmem:[%s4085_s20 + $0x614] ss:$144 sps:$4 sm:$0xff]   ;;  %v3715_v63 = vld [vmem:[%s4085_s20 + $0x61c] ss:$144 sps:$4 sm:$0xff]  }
 0x112   : > { %2440 = vmatprep.subr.bf16.mxu1 %v3625_v1  ;;  %v3710_v1 = vld [vmem:[%s4085_s20 + $0x610] ss:$144 sps:$4 sm:$0xff]  }
 0x114   : > { %2398 = vmatpush1.bf16.msra.mxu0 %v3620_v2  ;;  %v3713_v2 = vld [vmem:[%s4085_s20 + $0x618] ss:$144 sps:$4 sm:$0xff]  }
 0x115   : > { %2441 = vmatpush1.bf16.msra.mxu1 %v3623_v3  ;;  %2399 = vmatprep.subr.bf16.mxu0 %v3628_v4  ;;  %v4383_v3 = vpop.permute.xlu0 %506  ;;  %v3718_v4 = vld [vmem:[%s4085_s20 + $0x734] ss:$144 sps:$4 sm:$0xff]  }
 0x116   : > { %2442 = vmatprep.subr.bf16.mxu1 %v3631_v5  ;;  %v3721_v5 = vld [vmem:[%s4085_s20 + $0x73c] ss:$144 sps:$4 sm:$0xff]  }
 0x118   : > { %2400 = vmatpush1.bf16.msra.mxu0 %v3626_v6 }
 0x119   : > { %2443 = vmatpush1.bf16.msra.mxu1 %v3629_v7  ;;  %2471 = vmatprep.subr.bf16.mxu0 %v3634_v8 }
 0x11a   : > { %2514 = vmatprep.subr.bf16.mxu1 %v3637_v9 }
 0x11b   : > { %2418 = vmatmul.mubr.bf16.vlgmr.msra.gmra.mrb[20].mxu0 %v4320_v14 }
 0x11c   : > { %2461 = vmatmul.mubr.bf16.vlgmr.msra.gmra.mrb[20].mxu1 %v4320_v14  ;;  %2472 = vmatpush1.bf16.msra.mxu0 %v3632_v10 }
 0x11d   : > { %2515 = vmatpush1.bf16.msra.mxu1 %v3635_v11  ;;  %2473 = vmatprep.subr.bf16.mxu0 %v3640_v12  ;;  %v3716_v12 = vld [vmem:[%s4085_s20 + $0x730] ss:$144 sps:$4 sm:$0xff]  }
 0x11e   : > { %2516 = vmatprep.subr.bf16.mxu1 %v3643_v13  ;;  %2503 = vmatprep.mubr.bf16.mxu0 %v3914_v0 }
 0x11f   : > { %2546 = vmatprep.mubr.bf16.mxu1 %v3914_v0 }
 0x120   : > { %2474 = vmatpush1.bf16.msra.mxu0 %v3638_v15 }
 0x121   : > { %2517 = vmatpush1.bf16.msra.mxu1 %v3641_v16  ;;  %2475 = vmatprep.subr.bf16.mxu0 %v3646_v17 }
 0x122   : > { %2518 = vmatprep.subr.bf16.mxu1 %v3649_v18  ;;  %v3719_v18 = vld [vmem:[%s4085_s20 + $0x738] ss:$144 sps:$4 sm:$0xff]  }
 0x124   : > { %2476 = vmatpush1.bf16.msra.mxu0 %v3644_v19  ;;  %v3724_v19 = vld [vmem:[%s4085_s20 + $0x854] ss:$144 sps:$4 sm:$0xff]  }
 0x125   : > { %2519 = vmatpush1.bf16.msra.mxu1 %v3647_v20  ;;  %2477 = vmatprep.subr.bf16.mxu0 %v3652_v21 }
 0x126   : > { %2520 = vmatprep.subr.bf16.mxu1 %v3655_v22 }
 0x128   : > { %2478 = vmatpush1.bf16.msra.mxu0 %v3650_v23 }
 0x129   : > { %2521 = vmatpush1.bf16.msra.mxu1 %v3653_v24  ;;  %2479 = vmatprep.subr.bf16.mxu0 %v3658_v25 }
 0x12a   : > { %2522 = vmatprep.subr.bf16.mxu1 %v3661_v26  ;;  %v3727_v26 = vld [vmem:[%s4085_s20 + $0x85c] ss:$144 sps:$4 sm:$0xff]  }
 0x12c   : > { %2480 = vmatpush1.bf16.msra.mxu0 %v3656_v27 }
 0x12d   : > { %2523 = vmatpush1.bf16.msra.mxu1 %v3659_v28  ;;  %2481 = vmatprep.subr.bf16.mxu0 %v3664_v29 }
 0x12e   : > { %2524 = vmatprep.subr.bf16.mxu1 %v3667_v30 }
 0x130   : > { %2482 = vmatpush1.bf16.msra.mxu0 %v3662_v31 }
 0x131   : > { %2525 = vmatpush1.bf16.msra.mxu1 %v3665_v32  ;;  %2483 = vmatprep.subr.bf16.mxu0 %v3670_v33 }
 0x132   : > { %2526 = vmatprep.subr.bf16.mxu1 %v3673_v34 }
 0x134   : > { %2484 = vmatpush1.bf16.msra.mxu0 %v3668_v36  ;;  %v3722_v36 = vld [vmem:[%s4085_s20 + $0x850] ss:$144 sps:$4 sm:$0xff]  }
 0x135   : > { %2527 = vmatpush1.bf16.msra.mxu1 %v3671_v37  ;;  %2485 = vmatprep.subr.bf16.mxu0 %v3676_v38  ;;  %v3725_v37 = vld [vmem:[%s4085_s20 + $0x858] ss:$144 sps:$4 sm:$0xff]   ;;  %v3730_v38 = vld [vmem:[%s4085_s20 + $0x84] ss:$144 sps:$4 sm:$0xff]  }
 0x136   : > { %2528 = vmatprep.subr.bf16.mxu1 %v3679_v39  ;;  %v3733_v39 = vld [vmem:[%s4085_s20 + $0x8c] ss:$144 sps:$4 sm:$0xff]  }
 0x138   : > { %2486 = vmatpush1.bf16.msra.mxu0 %v3674_v40  ;;  %v3728_v40 = vld [vmem:[%s4085_s20 + $0x80] ss:$144 sps:$4 sm:$0xff]  }
 0x139   : > { %2529 = vmatpush1.bf16.msra.mxu1 %v3677_v41  ;;  %2557 = vmatprep.subr.bf16.mxu0 %v3682_v42  ;;  %v3731_v41 = vld [vmem:[%s4085_s20 + $0x88] ss:$144 sps:$4 sm:$0xff]   ;;  %v3736_v42 = vld [vmem:[%s4085_s20 + $0x1a4] ss:$144 sps:$4 sm:$0xff]  }
 0x13a   : > { %2600 = vmatprep.subr.bf16.mxu1 %v3685_v43  ;;  %v3739_v43 = vld [vmem:[%s4085_s20 + $0x1ac] ss:$144 sps:$4 sm:$0xff]  }
 0x13b   : > { %2504 = vmatmul.mubr.bf16.vlgmr.msra.gmra.mrb[24].mxu0 %v4320_v14 }
 0x13c   : > { %2547 = vmatmul.mubr.bf16.vlgmr.msra.gmra.mrb[24].mxu1 %v4320_v14  ;;  %2558 = vmatpush1.bf16.msra.mxu0 %v3680_v44  ;;  %v3734_v44 = vld [vmem:[%s4085_s20 + $0x1a0] ss:$144 sps:$4 sm:$0xff]  }
 0x13d   : > { %2601 = vmatpush1.bf16.msra.mxu1 %v3683_v45  ;;  %2559 = vmatprep.subr.bf16.mxu0 %v3688_v46  ;;  %v3737_v45 = vld [vmem:[%s4085_s20 + $0x1a8] ss:$144 sps:$4 sm:$0xff]   ;;  %v3742_v46 = vld [vmem:[%s4085_s20 + $0x2c4] ss:$144 sps:$4 sm:$0xff]  }
 0x13e   : > { %2602 = vmatprep.subr.bf16.mxu1 %v3691_v47  ;;  %2589 = vmatprep.mubr.bf16.mxu0 %v3914_v0  ;;  %v3745_v47 = vld [vmem:[%s4085_s20 + $0x2cc] ss:$144 sps:$4 sm:$0xff]  }
 0x13f   : > { %2632 = vmatprep.mubr.bf16.mxu1 %v3914_v0 }
 0x140   : > { %2560 = vmatpush1.bf16.msra.mxu0 %v3686_v48  ;;  %v3740_v48 = vld [vmem:[%s4085_s20 + $0x2c0] ss:$144 sps:$4 sm:$0xff]  }
 0x141   : > { %2603 = vmatpush1.bf16.msra.mxu1 %v3689_v49  ;;  %2561 = vmatprep.subr.bf16.mxu0 %v3694_v50  ;;  %v3743_v49 = vld [vmem:[%s4085_s20 + $0x2c8] ss:$144 sps:$4 sm:$0xff]   ;;  %v3748_v50 = vld [vmem:[%s4085_s20 + $0x3e4] ss:$144 sps:$4 sm:$0xff]  }
 0x142   : > { %2604 = vmatprep.subr.bf16.mxu1 %v3697_v35  ;;  %v3751_v35 = vld [vmem:[%s4085_s20 + $0x3ec] ss:$144 sps:$4 sm:$0xff]  }
 0x144   : > { %2562 = vmatpush1.bf16.msra.mxu0 %v3692_v51  ;;  %v3746_v51 = vld [vmem:[%s4085_s20 + $0x3e0] ss:$144 sps:$4 sm:$0xff]  }
 0x145   : > { %2605 = vmatpush1.bf16.msra.mxu1 %v3695_v52  ;;  %2563 = vmatprep.subr.bf16.mxu0 %v3700_v53  ;;  %v3749_v52 = vld [vmem:[%s4085_s20 + $0x3e8] ss:$144 sps:$4 sm:$0xff]   ;;  %v3757_v53 = vld [vmem:[%s4085_s20 + $0x50c] ss:$144 sps:$4 sm:$0xff]  }
 0x146   : > { %2606 = vmatprep.subr.bf16.mxu1 %v3703_v54  ;;  %v3752_v54 = vld [vmem:[%s4085_s20 + $0x500] ss:$144 sps:$4 sm:$0xff]  }
 0x148   : > { %2564 = vmatpush1.bf16.msra.mxu0 %v3698_v55  ;;  %v3755_v55 = vld [vmem:[%s4085_s20 + $0x508] ss:$144 sps:$4 sm:$0xff]  }
 0x149   : > { %2607 = vmatpush1.bf16.msra.mxu1 %v3701_v56  ;;  %2565 = vmatprep.subr.bf16.mxu0 %v3706_v57  ;;  %v3760_v56 = vld [vmem:[%s4085_s20 + $0x624] ss:$144 sps:$4 sm:$0xff]   ;;  %v3763_v57 = vld [vmem:[%s4085_s20 + $0x62c] ss:$144 sps:$4 sm:$0xff]  }
 0x14a   : > { %2608 = vmatprep.subr.bf16.mxu1 %v3709_v58  ;;  %v3758_v58 = vld [vmem:[%s4085_s20 + $0x620] ss:$144 sps:$4 sm:$0xff]  }
 0x14c   : > { %2566 = vmatpush1.bf16.msra.mxu0 %v3704_v60  ;;  %v3761_v60 = vld [vmem:[%s4085_s20 + $0x628] ss:$144 sps:$4 sm:$0xff]  }
 0x14d   : > { %2609 = vmatpush1.bf16.msra.mxu1 %v3707_v61  ;;  %2567 = vmatprep.subr.bf16.mxu0 %v3712_v62  ;;  %v3766_v61 = vld [vmem:[%s4085_s20 + $0x744] ss:$144 sps:$4 sm:$0xff]   ;;  %v3769_v62 = vld [vmem:[%s4085_s20 + $0x74c] ss:$144 sps:$4 sm:$0xff]  }
 0x14e   : > { %2610 = vmatprep.subr.bf16.mxu1 %v3715_v63  ;;  %v1989_v6 = vpop.f32.mrb[0].mxu0 }
 0x14f   : > { %v2032_v7 = vpop.f32.mrb[0].mxu1  ;;  %v1990_v8 = vadd.f32 %v1989_v6, %v4374_v59  ;;  %v1991_v10 = vpop.f32.mrb[1].mxu0 }
 0x150   : > { %v2033_v9 = vadd.f32 %v2032_v7, %v4374_v59  ;;  %v2034_v11 = vpop.f32.mrb[1].mxu1  ;;  %v1992_v13 = vadd.f32 %v1991_v10, %v4374_v59  ;;  %v1993_v16 = vpop.f32.mrb[2].mxu0  ;;  %2568 = vmatpush1.bf16.msra.mxu0 %v3710_v1  ;;  %v3764_v7 = vld [vmem:[%s4085_s20 + $0x740] ss:$144 sps:$4 sm:$0xff]  }
 0x151   : > { %v2035_v15 = vadd.f32 %v2034_v11, %v4374_v59  ;;  %v2036_v17 = vpop.f32.mrb[2].mxu1  ;;  %2611 = vmatpush1.bf16.msra.mxu1 %v3713_v2  ;;  %v2729_v20 = vmax.f32 %v1990_v8, 0.0  ;;  %v1994_v22 = vadd.f32 %v1993_v16, %v4383_v3  ;;  %v1995_v24 = vpop.f32.mrb[3].mxu0  ;;  %2569 = vmatprep.subr.bf16.mxu0 %v3718_v4 }
 0x152   : > { %v2731_v21 = vmax.f32 %v2033_v9, 0.0  ;;  %v2037_v23 = vadd.f32 %v2036_v17, %v4383_v3  ;;  %v2038_v25 = vpop.f32.mrb[3].mxu1  ;;  %2612 = vmatprep.subr.bf16.mxu1 %v3721_v5  ;;  %v2730_v27 = vmax.f32 %v1992_v13, 0.0  ;;  %v1996_v29 = vadd.f32 %v1995_v24, %v4383_v3  ;;  %v3772_v13 = vld [vmem:[%s4085_s20 + $0x864] ss:$144 sps:$4 sm:$0xff]  }
 0x153   : > { %v2732_v28 = vmax.f32 %v2035_v15, 0.0  ;;  %v2039_v30 = vadd.f32 %v2038_v25, %v4383_v3  ;;  %2801 = vst [vmem:[%s4401_s29] sm:$0xff] %v2729_v20  ;;  %v2765_v31 = vmax.f32 %v1994_v22, 0.0 }
 0x154   : > { %2803 = vst [vmem:[%s4401_s29 + $0x10] sm:$0xff] %v2731_v21  ;;  %v2767_v32 = vmax.f32 %v2037_v23, 0.0  ;;  %2802 = vst [vmem:[%s4401_s29 + $0x8] sm:$0xff] %v2730_v27  ;;  %v2766_v33 = vmax.f32 %v1996_v29, 0.0  ;;  %2570 = vmatpush1.bf16.msra.mxu0 %v3716_v12  ;;  %v3767_v12 = vld [vmem:[%s4085_s20 + $0x748] ss:$144 sps:$4 sm:$0xff]  }
 0x155   : > { %2804 = vst [vmem:[%s4401_s29 + $0x18] sm:$0xff] %v2732_v28  ;;  %v2768_v34 = vmax.f32 %v2039_v30, 0.0  ;;  %2613 = vmatpush1.bf16.msra.mxu1 %v3719_v18  ;;  %2837 = vst [vmem:[%s4401_s29 + $0x120] sm:$0xff] %v2765_v31  ;;  %2571 = vmatprep.subr.bf16.mxu0 %v3724_v19  ;;  %v3775_v21 = vld [vmem:[%s4085_s20 + $0x86c] ss:$144 sps:$4 sm:$0xff]  }
 0x156   : > { %2839 = vst [vmem:[%s4401_s29 + $0x130] sm:$0xff] %v2767_v32  ;;  %2614 = vmatprep.subr.bf16.mxu1 %v3727_v26  ;;  %2838 = vst [vmem:[%s4401_s29 + $0x128] sm:$0xff] %v2766_v33  ;;  %v3770_v30 = vld [vmem:[%s4085_s20 + $0x860] ss:$144 sps:$4 sm:$0xff]   ;;  %v3773_v31 = vld [vmem:[%s4085_s20 + $0x868] ss:$144 sps:$4 sm:$0xff]  }
 0x157   : > { %2840 = vst [vmem:[%s4401_s29 + $0x138] sm:$0xff] %v2768_v34 }
 0x158   : > { %2572 = vmatpush1.bf16.msra.mxu0 %v3722_v36 }
 0x159   : > { %2615 = vmatpush1.bf16.msra.mxu1 %v3725_v37  ;;  %2643 = vmatprep.subr.bf16.mxu0 %v3730_v38 }
 0x15a   : > { %2686 = vmatprep.subr.bf16.mxu1 %v3733_v39 }
 0x15b   : > { %2590 = vmatmul.mubr.bf16.vlgmr.msra.gmra.mrb[28].mxu0 %v4320_v14 }
 0x15c   : > { %2633 = vmatmul.mubr.bf16.vlgmr.msra.gmra.mrb[28].mxu1 %v4320_v14  ;;  %2644 = vmatpush1.bf16.msra.mxu0 %v3728_v40 }
 0x15d   : > { %2687 = vmatpush1.bf16.msra.mxu1 %v3731_v41  ;;  %2645 = vmatprep.subr.bf16.mxu0 %v3736_v42 }
 0x15e   : > { %2688 = vmatprep.subr.bf16.mxu1 %v3739_v43  ;;  %2675 = vmatprep.mubr.bf16.mxu0 %v3914_v0 }
 0x15f   : > { %2718 = vmatprep.mubr.bf16.mxu1 %v3914_v0  ;;  %v3754_v0 = vld [vmem:[%s4085_s20 + $0x504] ss:$144 sps:$4 sm:$0xff]  }
 0x160   : > { %2646 = vmatpush1.bf16.msra.mxu0 %v3734_v44 }
 0x161   : > { %2689 = vmatpush1.bf16.msra.mxu1 %v3737_v45  ;;  %2647 = vmatprep.subr.bf16.mxu0 %v3742_v46 }
 0x162   : > { %2690 = vmatprep.subr.bf16.mxu1 %v3745_v47 }
 0x164   : > { %2648 = vmatpush1.bf16.msra.mxu0 %v3740_v48 }
 0x165   : > { %2691 = vmatpush1.bf16.msra.mxu1 %v3743_v49  ;;  %2649 = vmatprep.subr.bf16.mxu0 %v3748_v50 }
 0x166   : > { %2692 = vmatprep.subr.bf16.mxu1 %v3751_v35 }
 0x168   : > { %2650 = vmatpush1.bf16.msra.mxu0 %v3746_v51 }
 0x169   : > { %2693 = vmatpush1.bf16.msra.mxu1 %v3749_v52  ;;  %2651 = vmatprep.subr.bf16.mxu0 %v3754_v0 }
 0x16a   : > { %2694 = vmatprep.subr.bf16.mxu1 %v3757_v53 }
 0x16c   : > { %2652 = vmatpush1.bf16.msra.mxu0 %v3752_v54 }
 0x16d   : > { %2695 = vmatpush1.bf16.msra.mxu1 %v3755_v55  ;;  %2653 = vmatprep.subr.bf16.mxu0 %v3760_v56 }
 0x16e   : > { %2696 = vmatprep.subr.bf16.mxu1 %v3763_v57  ;;  %v2075_v63 = vpop.f32.mrb[4].mxu0 }
 0x16f   : > { %v2118_v1 = vpop.f32.mrb[4].mxu1  ;;  %v2076_v2 = vadd.f32 %v2075_v63, %v4374_v59  ;;  %v2077_v5 = vpop.f32.mrb[5].mxu0 }
 0x170   : > { %v2119_v4 = vadd.f32 %v2118_v1, %v4374_v59  ;;  %v2120_v6 = vpop.f32.mrb[5].mxu1  ;;  %v2078_v8 = vadd.f32 %v2077_v5, %v4374_v59  ;;  %v2079_v10 = vpop.f32.mrb[6].mxu0  ;;  %2654 = vmatpush1.bf16.msra.mxu0 %v3758_v58 }
 0x171   : > { %v2121_v9 = vadd.f32 %v2120_v6, %v4374_v59  ;;  %v2122_v11 = vpop.f32.mrb[6].mxu1  ;;  %2697 = vmatpush1.bf16.msra.mxu1 %v3761_v60  ;;  %v2733_v15 = vmax.f32 %v2076_v2, 0.0  ;;  %v2080_v17 = vadd.f32 %v2079_v10, %v4383_v3  ;;  %v2081_v19 = vpop.f32.mrb[7].mxu0  ;;  %2655 = vmatprep.subr.bf16.mxu0 %v3766_v61 }
 0x172   : > { %v2735_v16 = vmax.f32 %v2119_v4, 0.0  ;;  %v2123_v18 = vadd.f32 %v2122_v11, %v4383_v3  ;;  %v2124_v20 = vpop.f32.mrb[7].mxu1  ;;  %2698 = vmatprep.subr.bf16.mxu1 %v3769_v62  ;;  %v2734_v22 = vmax.f32 %v2078_v8, 0.0  ;;  %v2082_v24 = vadd.f32 %v2081_v19, %v4383_v3 }
 0x173   : > { %v2736_v23 = vmax.f32 %v2121_v9, 0.0  ;;  %v2125_v25 = vadd.f32 %v2124_v20, %v4383_v3  ;;  %2805 = vst [vmem:[%s4401_s29 + $0x20] sm:$0xff] %v2733_v15  ;;  %v2769_v26 = vmax.f32 %v2080_v17, 0.0 }
 0x174   : > { %2807 = vst [vmem:[%s4401_s29 + $0x30] sm:$0xff] %v2735_v16  ;;  %v2771_v27 = vmax.f32 %v2123_v18, 0.0  ;;  %2806 = vst [vmem:[%s4401_s29 + $0x28] sm:$0xff] %v2734_v22  ;;  %v2770_v28 = vmax.f32 %v2082_v24, 0.0  ;;  %2656 = vmatpush1.bf16.msra.mxu0 %v3764_v7 }
 0x175   : > { %2808 = vst [vmem:[%s4401_s29 + $0x38] sm:$0xff] %v2736_v23  ;;  %v2772_v29 = vmax.f32 %v2125_v25, 0.0  ;;  %2699 = vmatpush1.bf16.msra.mxu1 %v3767_v12  ;;  %2841 = vst [vmem:[%s4401_s29 + $0x140] sm:$0xff] %v2769_v26  ;;  %2657 = vmatprep.subr.bf16.mxu0 %v3772_v13 }
 0x176   : > { %2843 = vst [vmem:[%s4401_s29 + $0x150] sm:$0xff] %v2771_v27  ;;  %2700 = vmatprep.subr.bf16.mxu1 %v3775_v21  ;;  %2842 = vst [vmem:[%s4401_s29 + $0x148] sm:$0xff] %v2770_v28 }
 0x177   : > { %2844 = vst [vmem:[%s4401_s29 + $0x158] sm:$0xff] %v2772_v29 }
 0x178   : > { %2658 = vmatpush1.bf16.msra.mxu0 %v3770_v30 }
 0x179   : > { %2701 = vmatpush1.bf16.msra.mxu1 %v3773_v31 }
 0x17b   : > { %2676 = vmatmul.mubr.bf16.vlgmr.msra.gmra.mrb[32].mxu0 %v4320_v14 }
 0x17c   : > { %2719 = vmatmul.mubr.bf16.vlgmr.msra.gmra.mrb[32].mxu1 %v4320_v14 }
 0x18e   : > { %v2161_v32 = vpop.f32.mrb[8].mxu0 }
 0x18f   : > { %v2204_v33 = vpop.f32.mrb[8].mxu1  ;;  %v2162_v34 = vadd.f32 %v2161_v32, %v4374_v59  ;;  %v2163_v37 = vpop.f32.mrb[9].mxu0 }
 0x190   : > { %v2205_v36 = vadd.f32 %v2204_v33, %v4374_v59  ;;  %v2206_v38 = vpop.f32.mrb[9].mxu1  ;;  %v2164_v39 = vadd.f32 %v2163_v37, %v4374_v59  ;;  %v2165_v41 = vpop.f32.mrb[10].mxu0 }
 0x191   : > { %v2207_v40 = vadd.f32 %v2206_v38, %v4374_v59  ;;  %v2208_v42 = vpop.f32.mrb[10].mxu1  ;;  %v2737_v43 = vmax.f32 %v2162_v34, 0.0  ;;  %v2166_v44 = vadd.f32 %v2165_v41, %v4383_v3  ;;  %v2167_v46 = vpop.f32.mrb[11].mxu0 }
 0x192   : > { %v2739_v14 = vmax.f32 %v2205_v36, 0.0  ;;  %v2209_v45 = vadd.f32 %v2208_v42, %v4383_v3  ;;  %v2210_v47 = vpop.f32.mrb[11].mxu1  ;;  %v2738_v48 = vmax.f32 %v2164_v39, 0.0  ;;  %v2168_v50 = vadd.f32 %v2167_v46, %v4383_v3 }
 0x193   : > { %v2740_v49 = vmax.f32 %v2207_v40, 0.0  ;;  %v2211_v35 = vadd.f32 %v2210_v47, %v4383_v3  ;;  %2809 = vst [vmem:[%s4401_s29 + $0x40] sm:$0xff] %v2737_v43  ;;  %v2773_v51 = vmax.f32 %v2166_v44, 0.0 }
 0x194   : > { %2811 = vst [vmem:[%s4401_s29 + $0x50] sm:$0xff] %v2739_v14  ;;  %v2775_v52 = vmax.f32 %v2209_v45, 0.0  ;;  %2810 = vst [vmem:[%s4401_s29 + $0x48] sm:$0xff] %v2738_v48  ;;  %v2774_v0 = vmax.f32 %v2168_v50, 0.0 }
 0x195   : > { %2812 = vst [vmem:[%s4401_s29 + $0x58] sm:$0xff] %v2740_v49  ;;  %v2776_v53 = vmax.f32 %v2211_v35, 0.0  ;;  %2845 = vst [vmem:[%s4401_s29 + $0x160] sm:$0xff] %v2773_v51 }
 0x196   : > { %2847 = vst [vmem:[%s4401_s29 + $0x170] sm:$0xff] %v2775_v52  ;;  %2846 = vst [vmem:[%s4401_s29 + $0x168] sm:$0xff] %v2774_v0 }
 0x197   : > { %2848 = vst [vmem:[%s4401_s29 + $0x178] sm:$0xff] %v2776_v53 }
 0x1ae   : > { %v2247_v54 = vpop.f32.mrb[12].mxu0 }
 0x1af   : > { %v2290_v55 = vpop.f32.mrb[12].mxu1  ;;  %v2248_v56 = vadd.f32 %v2247_v54, %v4374_v59  ;;  %v2249_v58 = vpop.f32.mrb[13].mxu0 }
 0x1b0   : > { %v2291_v57 = vadd.f32 %v2290_v55, %v4374_v59  ;;  %v2292_v60 = vpop.f32.mrb[13].mxu1  ;;  %v2250_v61 = vadd.f32 %v2249_v58, %v4374_v59  ;;  %v2251_v63 = vpop.f32.mrb[14].mxu0 }
 0x1b1   : > { %v2293_v62 = vadd.f32 %v2292_v60, %v4374_v59  ;;  %v2294_v1 = vpop.f32.mrb[14].mxu1  ;;  %v2741_v2 = vmax.f32 %v2248_v56, 0.0  ;;  %v2252_v5 = vadd.f32 %v2251_v63, %v4383_v3  ;;  %v2253_v7 = vpop.f32.mrb[15].mxu0 }
 0x1b2   : > { %v2743_v4 = vmax.f32 %v2291_v57, 0.0  ;;  %v2295_v6 = vadd.f32 %v2294_v1, %v4383_v3  ;;  %v2296_v8 = vpop.f32.mrb[15].mxu1  ;;  %v2742_v9 = vmax.f32 %v2250_v61, 0.0  ;;  %v2254_v11 = vadd.f32 %v2253_v7, %v4383_v3 }
 0x1b3   : > { %v2744_v10 = vmax.f32 %v2293_v62, 0.0  ;;  %v2297_v12 = vadd.f32 %v2296_v8, %v4383_v3  ;;  %2813 = vst [vmem:[%s4401_s29 + $0x60] sm:$0xff] %v2741_v2  ;;  %v2777_v13 = vmax.f32 %v2252_v5, 0.0 }
 0x1b4   : > { %2815 = vst [vmem:[%s4401_s29 + $0x70] sm:$0xff] %v2743_v4  ;;  %v2779_v15 = vmax.f32 %v2295_v6, 0.0  ;;  %2814 = vst [vmem:[%s4401_s29 + $0x68] sm:$0xff] %v2742_v9  ;;  %v2778_v16 = vmax.f32 %v2254_v11, 0.0 }
 0x1b5   : > { %2816 = vst [vmem:[%s4401_s29 + $0x78] sm:$0xff] %v2744_v10  ;;  %v2780_v17 = vmax.f32 %v2297_v12, 0.0  ;;  %2849 = vst [vmem:[%s4401_s29 + $0x180] sm:$0xff] %v2777_v13 }
 0x1b6   : > { %2851 = vst [vmem:[%s4401_s29 + $0x190] sm:$0xff] %v2779_v15  ;;  %2850 = vst [vmem:[%s4401_s29 + $0x188] sm:$0xff] %v2778_v16 }
 0x1b7   : > { %2852 = vst [vmem:[%s4401_s29 + $0x198] sm:$0xff] %v2780_v17 }
 0x1ce   : > { %v2333_v18 = vpop.f32.mrb[16].mxu0 }
 0x1cf   : > { %v2376_v19 = vpop.f32.mrb[16].mxu1  ;;  %v2334_v20 = vadd.f32 %v2333_v18, %v4374_v59  ;;  %v2335_v22 = vpop.f32.mrb[17].mxu0 }
 0x1d0   : > { %v2377_v21 = vadd.f32 %v2376_v19, %v4374_v59  ;;  %v2378_v23 = vpop.f32.mrb[17].mxu1  ;;  %v2336_v24 = vadd.f32 %v2335_v22, %v4374_v59  ;;  %v2337_v26 = vpop.f32.mrb[18].mxu0 }
 0x1d1   : > { %v2379_v25 = vadd.f32 %v2378_v23, %v4374_v59  ;;  %v2380_v27 = vpop.f32.mrb[18].mxu1  ;;  %v2745_v28 = vmax.f32 %v2334_v20, 0.0  ;;  %v2338_v30 = vadd.f32 %v2337_v26, %v4383_v3  ;;  %v2339_v32 = vpop.f32.mrb[19].mxu0 }
 0x1d2   : > { %v2747_v29 = vmax.f32 %v2377_v21, 0.0  ;;  %v2381_v31 = vadd.f32 %v2380_v27, %v4383_v3  ;;  %v2382_v33 = vpop.f32.mrb[19].mxu1  ;;  %v2746_v34 = vmax.f32 %v2336_v24, 0.0  ;;  %v2340_v37 = vadd.f32 %v2339_v32, %v4383_v3 }
 0x1d3   : > { %v2748_v36 = vmax.f32 %v2379_v25, 0.0  ;;  %v2383_v38 = vadd.f32 %v2382_v33, %v4383_v3  ;;  %2817 = vst [vmem:[%s4401_s29 + $0x80] sm:$0xff] %v2745_v28  ;;  %v2781_v39 = vmax.f32 %v2338_v30, 0.0 }
 0x1d4   : > { %2819 = vst [vmem:[%s4401_s29 + $0x90] sm:$0xff] %v2747_v29  ;;  %v2783_v40 = vmax.f32 %v2381_v31, 0.0  ;;  %2818 = vst [vmem:[%s4401_s29 + $0x88] sm:$0xff] %v2746_v34  ;;  %v2782_v41 = vmax.f32 %v2340_v37, 0.0 }
 0x1d5   : > { %2820 = vst [vmem:[%s4401_s29 + $0x98] sm:$0xff] %v2748_v36  ;;  %v2784_v42 = vmax.f32 %v2383_v38, 0.0  ;;  %2853 = vst [vmem:[%s4401_s29 + $0x1a0] sm:$0xff] %v2781_v39 }
 0x1d6   : > { %2855 = vst [vmem:[%s4401_s29 + $0x1b0] sm:$0xff] %v2783_v40  ;;  %2854 = vst [vmem:[%s4401_s29 + $0x1a8] sm:$0xff] %v2782_v41 }
 0x1d7   : > { %2856 = vst [vmem:[%s4401_s29 + $0x1b8] sm:$0xff] %v2784_v42 }
 0x1ee   : > { %v2419_v43 = vpop.f32.mrb[20].mxu0 }
 0x1ef   : > { %v2462_v14 = vpop.f32.mrb[20].mxu1  ;;  %v2420_v44 = vadd.f32 %v2419_v43, %v4374_v59  ;;  %v2421_v46 = vpop.f32.mrb[21].mxu0 }
 0x1f0   : > { %v2463_v45 = vadd.f32 %v2462_v14, %v4374_v59  ;;  %v2464_v47 = vpop.f32.mrb[21].mxu1  ;;  %v2422_v48 = vadd.f32 %v2421_v46, %v4374_v59  ;;  %v2423_v50 = vpop.f32.mrb[22].mxu0 }
 0x1f1   : > { %v2465_v49 = vadd.f32 %v2464_v47, %v4374_v59  ;;  %v2466_v35 = vpop.f32.mrb[22].mxu1  ;;  %v2749_v51 = vmax.f32 %v2420_v44, 0.0  ;;  %v2424_v0 = vadd.f32 %v2423_v50, %v4383_v3  ;;  %v2425_v54 = vpop.f32.mrb[23].mxu0 }
 0x1f2   : > { %v2751_v52 = vmax.f32 %v2463_v45, 0.0  ;;  %v2467_v53 = vadd.f32 %v2466_v35, %v4383_v3  ;;  %v2468_v55 = vpop.f32.mrb[23].mxu1  ;;  %v2750_v56 = vmax.f32 %v2422_v48, 0.0  ;;  %v2426_v58 = vadd.f32 %v2425_v54, %v4383_v3 }
 0x1f3   : > { %v2752_v57 = vmax.f32 %v2465_v49, 0.0  ;;  %v2469_v60 = vadd.f32 %v2468_v55, %v4383_v3  ;;  %2821 = vst [vmem:[%s4401_s29 + $0xa0] sm:$0xff] %v2749_v51  ;;  %v2785_v61 = vmax.f32 %v2424_v0, 0.0 }
 0x1f4   : > { %2823 = vst [vmem:[%s4401_s29 + $0xb0] sm:$0xff] %v2751_v52  ;;  %v2787_v62 = vmax.f32 %v2467_v53, 0.0  ;;  %2822 = vst [vmem:[%s4401_s29 + $0xa8] sm:$0xff] %v2750_v56  ;;  %v2786_v63 = vmax.f32 %v2426_v58, 0.0 }
 0x1f5   : > { %2824 = vst [vmem:[%s4401_s29 + $0xb8] sm:$0xff] %v2752_v57  ;;  %v2788_v1 = vmax.f32 %v2469_v60, 0.0  ;;  %2857 = vst [vmem:[%s4401_s29 + $0x1c0] sm:$0xff] %v2785_v61 }
 0x1f6   : > { %2859 = vst [vmem:[%s4401_s29 + $0x1d0] sm:$0xff] %v2787_v62  ;;  %2858 = vst [vmem:[%s4401_s29 + $0x1c8] sm:$0xff] %v2786_v63 }
 0x1f7   : > { %2860 = vst [vmem:[%s4401_s29 + $0x1d8] sm:$0xff] %v2788_v1 }
 0x20e   : > { %v2505_v2 = vpop.f32.mrb[24].mxu0 }
 0x20f   : > { %v2548_v4 = vpop.f32.mrb[24].mxu1  ;;  %v2506_v5 = vadd.f32 %v2505_v2, %v4374_v59  ;;  %v2507_v7 = vpop.f32.mrb[25].mxu0 }
 0x210   : > { %v2549_v6 = vadd.f32 %v2548_v4, %v4374_v59  ;;  %v2550_v8 = vpop.f32.mrb[25].mxu1  ;;  %v2508_v9 = vadd.f32 %v2507_v7, %v4374_v59  ;;  %v2509_v11 = vpop.f32.mrb[26].mxu0 }
 0x211   : > { %v2551_v10 = vadd.f32 %v2550_v8, %v4374_v59  ;;  %v2552_v12 = vpop.f32.mrb[26].mxu1  ;;  %v2753_v13 = vmax.f32 %v2506_v5, 0.0  ;;  %v2510_v16 = vadd.f32 %v2509_v11, %v4383_v3  ;;  %v2511_v18 = vpop.f32.mrb[27].mxu0 }
 0x212   : > { %v2755_v15 = vmax.f32 %v2549_v6, 0.0  ;;  %v2553_v17 = vadd.f32 %v2552_v12, %v4383_v3  ;;  %v2554_v19 = vpop.f32.mrb[27].mxu1  ;;  %v2754_v20 = vmax.f32 %v2508_v9, 0.0  ;;  %v2512_v22 = vadd.f32 %v2511_v18, %v4383_v3 }
 0x213   : > { %v2756_v21 = vmax.f32 %v2551_v10, 0.0  ;;  %v2555_v23 = vadd.f32 %v2554_v19, %v4383_v3  ;;  %2825 = vst [vmem:[%s4401_s29 + $0xc0] sm:$0xff] %v2753_v13  ;;  %v2789_v24 = vmax.f32 %v2510_v16, 0.0 }
 0x214   : > { %2827 = vst [vmem:[%s4401_s29 + $0xd0] sm:$0xff] %v2755_v15  ;;  %v2791_v25 = vmax.f32 %v2553_v17, 0.0  ;;  %2826 = vst [vmem:[%s4401_s29 + $0xc8] sm:$0xff] %v2754_v20  ;;  %v2790_v26 = vmax.f32 %v2512_v22, 0.0 }
 0x215   : > { %2828 = vst [vmem:[%s4401_s29 + $0xd8] sm:$0xff] %v2756_v21  ;;  %v2792_v27 = vmax.f32 %v2555_v23, 0.0  ;;  %2861 = vst [vmem:[%s4401_s29 + $0x1e0] sm:$0xff] %v2789_v24 }
 0x216   : > { %2863 = vst [vmem:[%s4401_s29 + $0x1f0] sm:$0xff] %v2791_v25  ;;  %2862 = vst [vmem:[%s4401_s29 + $0x1e8] sm:$0xff] %v2790_v26 }
 0x217   : > { %2864 = vst [vmem:[%s4401_s29 + $0x1f8] sm:$0xff] %v2792_v27 }
 0x22e   : > { %v2591_v28 = vpop.f32.mrb[28].mxu0 }
 0x22f   : > { %v2634_v29 = vpop.f32.mrb[28].mxu1  ;;  %v2592_v30 = vadd.f32 %v2591_v28, %v4374_v59  ;;  %v2593_v32 = vpop.f32.mrb[29].mxu0 }
 0x230   : > { %v2635_v31 = vadd.f32 %v2634_v29, %v4374_v59  ;;  %v2636_v33 = vpop.f32.mrb[29].mxu1  ;;  %v2594_v34 = vadd.f32 %v2593_v32, %v4374_v59  ;;  %v2595_v37 = vpop.f32.mrb[30].mxu0 }
 0x231   : > { %v2637_v36 = vadd.f32 %v2636_v33, %v4374_v59  ;;  %v2638_v38 = vpop.f32.mrb[30].mxu1  ;;  %v2757_v39 = vmax.f32 %v2592_v30, 0.0  ;;  %v2596_v41 = vadd.f32 %v2595_v37, %v4383_v3  ;;  %v2597_v43 = vpop.f32.mrb[31].mxu0 }
 0x232   : > { %v2759_v40 = vmax.f32 %v2635_v31, 0.0  ;;  %v2639_v42 = vadd.f32 %v2638_v38, %v4383_v3  ;;  %v2640_v14 = vpop.f32.mrb[31].mxu1  ;;  %v2758_v44 = vmax.f32 %v2594_v34, 0.0  ;;  %v2598_v46 = vadd.f32 %v2597_v43, %v4383_v3 }
 0x233   : > { %v2760_v45 = vmax.f32 %v2637_v36, 0.0  ;;  %v2641_v47 = vadd.f32 %v2640_v14, %v4383_v3  ;;  %2829 = vst [vmem:[%s4401_s29 + $0xe0] sm:$0xff] %v2757_v39  ;;  %v2793_v48 = vmax.f32 %v2596_v41, 0.0 }
 0x234   : > { %2831 = vst [vmem:[%s4401_s29 + $0xf0] sm:$0xff] %v2759_v40  ;;  %v2795_v49 = vmax.f32 %v2639_v42, 0.0  ;;  %2830 = vst [vmem:[%s4401_s29 + $0xe8] sm:$0xff] %v2758_v44  ;;  %v2794_v50 = vmax.f32 %v2598_v46, 0.0 }
 0x235   : > { %2832 = vst [vmem:[%s4401_s29 + $0xf8] sm:$0xff] %v2760_v45  ;;  %v2796_v35 = vmax.f32 %v2641_v47, 0.0  ;;  %2865 = vst [vmem:[%s4401_s29 + $0x200] sm:$0xff] %v2793_v48 }
 0x236   : > { %2867 = vst [vmem:[%s4401_s29 + $0x210] sm:$0xff] %v2795_v49  ;;  %2866 = vst [vmem:[%s4401_s29 + $0x208] sm:$0xff] %v2794_v50 }
 0x237   : > { %2868 = vst [vmem:[%s4401_s29 + $0x218] sm:$0xff] %v2796_v35 }
 0x24e   : > { %v2677_v51 = vpop.f32.mrb[32].mxu0 }
 0x24f   : > { %v2720_v52 = vpop.f32.mrb[32].mxu1  ;;  %v2678_v0 = vadd.f32 %v2677_v51, %v4374_v59  ;;  %v2679_v54 = vpop.f32.mrb[33].mxu0 }
 0x250   : > { %v2721_v53 = vadd.f32 %v2720_v52, %v4374_v59  ;;  %v2722_v55 = vpop.f32.mrb[33].mxu1  ;;  %v2680_v56 = vadd.f32 %v2679_v54, %v4374_v59  ;;  %v2681_v58 = vpop.f32.mrb[34].mxu0 }
 0x251   : > { %v2723_v57 = vadd.f32 %v2722_v55, %v4374_v59  ;;  %v2724_v60 = vpop.f32.mrb[34].mxu1  ;;  %v2761_v61 = vmax.f32 %v2678_v0, 0.0  ;;  %v2682_v63 = vadd.f32 %v2681_v58, %v4383_v3  ;;  %v2683_v2 = vpop.f32.mrb[35].mxu0 }
 0x252   : > { %v2763_v62 = vmax.f32 %v2721_v53, 0.0  ;;  %v2725_v1 = vadd.f32 %v2724_v60, %v4383_v3  ;;  %v2726_v4 = vpop.f32.mrb[35].mxu1  ;;  %v2762_v5 = vmax.f32 %v2680_v56, 0.0  ;;  %v2684_v59 = vadd.f32 %v2683_v2, %v4383_v3 }
 0x253   : > { %v2764_v6 = vmax.f32 %v2723_v57, 0.0  ;;  %v2727_v7 = vadd.f32 %v2726_v4, %v4383_v3  ;;  %2833 = vst [vmem:[%s4401_s29 + $0x100] sm:$0xff] %v2761_v61  ;;  %v2797_v8 = vmax.f32 %v2682_v63, 0.0 }
 0x254   : > { %2835 = vst [vmem:[%s4401_s29 + $0x110] sm:$0xff] %v2763_v62  ;;  %v2799_v9 = vmax.f32 %v2725_v1, 0.0  ;;  %2834 = vst [vmem:[%s4401_s29 + $0x108] sm:$0xff] %v2762_v5  ;;  %v2798_v10 = vmax.f32 %v2684_v59, 0.0 }
 0x255   : > { %2836 = vst [vmem:[%s4401_s29 + $0x118] sm:$0xff] %v2764_v6  ;;  %v2800_v11 = vmax.f32 %v2727_v7, 0.0  ;;  %2869 = vst [vmem:[%s4401_s29 + $0x220] sm:$0xff] %v2797_v8 }
 0x256   : > { %2871 = vst [vmem:[%s4401_s29 + $0x230] sm:$0xff] %v2799_v9  ;;  %2870 = vst [vmem:[%s4401_s29 + $0x228] sm:$0xff] %v2798_v10 }
 0x257   : > { %2872 = vst [vmem:[%s4401_s29 + $0x238] sm:$0xff] %v2800_v11 }
 0x258   : > { %3848 = shalt.err (!%p3845_p11)
}
 0x259   : > { %s3849_s19 = scalar_lea.hbm %s4576_s6, 9216  ;;  %s3853_s26 = scalar_lea.hbm %s4633_s3, 18432 }
 0x25a   : > { %p3850_p13 = scmp.ne.s32.totalorder %s4576_s6, %s3849_s19  ;;  %p3854_p12 = scmp.lt.u32.totalorder %s4576_s6, %s4633_s3 }
 0x25b   : > { %p3855_p3 = scmp.lt.u32.totalorder %s3853_s26, %s3849_s19  ;;  %p3857_p8 = scmp.lt.u32.totalorder %s3849_s19, %s4576_s6 }
 0x25c   : > { %p3851_p2 = pnand %p3850_p13, %p4651_p9 }
 0x25d   : > { %p3856_p0 = por %p3855_p3, %p3854_p12 }
 0x25e   : > { %p3852_p6 = pneg %p3851_p2 }
 0x25f   : > { %p3858_p10 = por %p3857_p8, %p3856_p0 }
 0x261   : > { %p3859_p1 = pnand %p3858_p10, %p3852_p6 }
 0x263   : > { %3862 = shalt.err (!%p3859_p1)
}
 0x264   : > { %s3916_s22 = smov 4608   ;;  %s3917_s29 = smov 9216  }
 0x265   : > { %s3918_s27 = smov 288  }
 0x266   : > { %3282 = dma.vmem_to_hbm [thread:$0]  (%p4651_p9), %s4580_s30, 9216, %s4576_s6, %s2874_s7, %s3916_s22, %s3917_s29, %s3918_s27  }
 0x267 PF: > { %s2902_s16 = sand.u32 1, %s3893_s12   ;;  %p4652_p4 = scmp.ne.s32.totalorder %s4641_s25, 0 }
 0x268   : > { %p4653_p7 = scmp.ge.s32.totalorder %s3905_s15, 2  ;;  %s2903_s5 = scalar_lea.sflag [#allocation4], %s2902_s16 }
 0x26a   : > { %p3293_p5 = pnand %p4653_p7, %p4652_p4 }
 0x26c   : > { %3888 = dma.done.wait (!%p3293_p5), %s2903_s5, 9216  }
 0x26d   : > { %3890 = vsyncadd (!%p3293_p5), %s2903_s5, 4294958080  ;;  %p17_p11 = scmp.ge.s32.totalorder %s3964_s18, 4   ;;  %s4654_s12 = smov %s3897_s13 }
 0x26e   : > { %s4655_s13 = smov %s3901_s14  ;;  %s4656_s14 = smov %s3976_s21 }
 0x26f   : > { %s4657_s15 = smov %s3964_s18  ;;  %19 = sbr.rel (!%p17_p11) target bundleno = 6 (0x6), region = 82 }
 0x276   :  { %2908 = vsyncpa [#allocation3], 1 }
 0x277   :  { %2910 = vsyncpa [#allocation3 + $0x1], 1 }
 0x278   :  { %2911 = vsyncpa [#allocation6], 1 }
 0x279   :  { %2913 = vsyncpa [#allocation6 + $0x1], 1 }
 0x27a   :  { %2914 = vsyncpa [#allocation4], 1 }
 0x27b   :  { %2916 = vsyncpa [#allocation4 + $0x1], 1 }

</bundles_post_ra>
